<compile_context>
chip_gen: v6e
topology: v6e:2x2x1
jax: 0.10.0
libtpu: 0.0.40
codegen_flags: <defaults>
</compile_context>

<pallas_src>
import functools

import jax
import jax.numpy as jnp
import numpy as np
from jax.experimental import pallas as pl
from jax.experimental.pallas import tpu as pltpu


def _newton_recip(x):
    """approx EUP reciprocal + one Newton step: relative error ~1e-7."""
    r = pl.reciprocal(x, approx=True)
    return r * (2.0 - x * r)


def _erf_f32(x):
    # Abramowitz & Stegun 7.1.26 rational approximation, |err| <= 1.5e-7.
    a1, a2, a3, a4, a5 = 0.254829592, -0.284496736, 1.421413741, -1.453152027, 1.061405429
    p = 0.3275911
    ax = jnp.abs(x)
    d = 1.0 + p * ax
    t = _newton_recip(d)          # EUP recip instead of a VALU divide
    poly = ((((a5 * t + a4) * t + a3) * t + a2) * t + a1) * t
    y = 1.0 - poly * jnp.exp(-ax * ax)
    return jnp.where(x >= 0.0, y, -y)


def _gelu_exact(x):
    # Matches PyTorch nn.GELU() default (exact, erf-based) to ~1.5e-7.
    return 0.5 * x * (1.0 + _erf_f32(x * 0.7071067811865476))


def _da_kernel(num_ways, num_prev, *refs):
    # refs layout:
    #   refs[0 .. T-1]        : xs_t   (1, C, S)   channel-major tiles (Xs[-1] == refs[T-1])
    #   refs[T + 0]           : w1t    (Hd, C)     activation dtype
    #   refs[T + 1]           : b1     (Hd, 1)     f32
    #   refs[T + 2]           : w2t    (M*T, Hd)   f32
    #   refs[T + 3]           : bias2  (M*T, 1)    f32 == conv bias + static bias
    #   refs[T+4 .. T+4+M-1]  : out_m  (1, C, S)   one per way
    xs_refs = refs[:num_prev]
    w1t_ref, b1_ref, w2t_ref, bias2_ref = refs[num_prev:num_prev + 4]
    out_refs = refs[num_prev + 4:]

    # ---- weight_gen on the last-layer tile (same tile that feeds the aggregation:
    #      Xs[-1] is DMA'd exactly once).  First matmul in the native input dtype
    #      (bf16 MXU path for bf16 inputs), f32 accumulation; second matmul in f32. ----
    x_last = xs_refs[num_prev - 1][0]                                   # (C, S)
    h = jnp.dot(w1t_ref[...], x_last, preferred_element_type=jnp.float32)
    h = _gelu_exact(h + b1_ref[...])                                    # (Hd, S) f32
    logits = jnp.dot(w2t_ref[...], h, preferred_element_type=jnp.float32)
    logits = logits + bias2_ref[...]                                    # (M*T, S) f32

    # ---- softmax over the num_prev axis, one full-width (T, S) group per way ----
    wts = []                                                            # wts[m] : (T, S)
    for m in range(num_ways):
        g = logits[m * num_prev:(m + 1) * num_prev, :]                  # (T, S)
        mx = jnp.max(g, axis=0, keepdims=True)                          # (1, S) XLU
        e = jnp.exp(g - mx)                                             # single EUP call
        denom = jnp.sum(e, axis=0, keepdims=True)                       # (1, S) XLU
        wts.append(e * _newton_recip(denom))                            # (T, S)

    # ---- aggregation: m-outer / t-inner, one live (C, S) f32 accumulator at a
    #      time, stored straight to its own output ref. ----
    for m in range(num_ways):
        w_m = wts[m]
        acc = w_m[0:1, :] * xs_refs[0][0].astype(jnp.float32)           # (C, S)
        for t in range(1, num_prev):
            acc = acc + w_m[t:t + 1, :] * xs_refs[t][0].astype(jnp.float32)
        out_refs[m][0] = acc.astype(out_refs[m].dtype)


def init_params(key, dim, layer_idx, num_ways=4, da_hidden_dim_ratio=2.0):
    """Deterministic parameter init mirroring the module's shapes.

    W1 ~ kaiming-normal (fan_in = dim, 1x1 kernel).  The module zero-inits W2;
    here small deterministic random values exercise the second matmul path.
    static_bias[:, -1] = 1.0 as in the module.
    """
    num_prev = layer_idx + 1
    hidden = int(dim * da_hidden_dim_ratio)
    mt = num_ways * num_prev
    k1, k2, k3, k4 = jax.random.split(key, 4)
    w1 = jax.random.normal(k1, (dim, hidden), jnp.float32) * np.sqrt(2.0 / dim)
    b1 = jax.random.uniform(k2, (1, hidden), jnp.float32,
                            -1.0 / np.sqrt(dim), 1.0 / np.sqrt(dim))
    w2 = jax.random.normal(k3, (hidden, mt), jnp.float32) * 0.02
    b2 = jax.random.uniform(k4, (1, mt), jnp.float32,
                            -1.0 / np.sqrt(hidden), 1.0 / np.sqrt(hidden))
    sb = jnp.zeros((num_ways, num_prev), jnp.float32).at[:, -1].set(1.0)
    sb_flat = sb.reshape(1, mt)                 # row-major (M, T) == conv channel order
    return (w1, b1, w2, b2, sb_flat)


def _vmem_capacity_bytes():
    try:
        cap = getattr(pltpu.get_tpu_info(), "vmem_capacity_bytes", None)
        if cap:
            return int(cap)
    except Exception:
        pass
    return 64 * 1024 * 1024     # conservative fallback: v7x per-TC VMEM


def _pick_tile_s(S_total, C, hidden, num_prev, num_ways, itemsize, budget, batch):
    """Largest lane-dense spatial tile whose double-buffered streams PLUS the
    in-kernel f32 intermediates fit the VMEM budget."""
    mt = num_ways * num_prev

    def fits(s):
        streams = 2 * (num_prev + num_ways) * C * s * itemsize          # in/out, dbl-buffered
        inter = (hidden + 2 * mt + 2 * C) * s * 4                       # h, logits/exp, acc + cast xt
        params = 2 * (hidden * C + mt * hidden + hidden + mt) * 4       # weights (dbl-buffered)
        return streams + inter + params <= budget

    cands = [s for s in (4096, 2048, 1024, 512, 256, 128)
             if S_total % s == 0 and fits(s)]
    if batch == 1:
        # keep >= 2 spatial tiles so v7x megacore (2 TCs) gets parallel work
        multi = [s for s in cands if S_total // s >= 2]
        if multi:
            return multi[0]
    if cands:
        return cands[0]
    for s in (128, 256, 512):                    # smallest lane-dense divisor fallback
        if S_total % s == 0:
            return s
    return S_total


def depthwise_aggregate(Xs, params, num_ways=4, *, tile_s=None):
    """Xs: list of (B, C, H, W) arrays (PyTorch NCHW). Returns tuple of num_ways (B, C, H, W)."""
    num_prev = len(Xs)
    B, C, H, W = Xs[-1].shape
    S_total = H * W
    dtype = Xs[-1].dtype

    w1, b1, w2, b2, sb = params
    hidden = w1.shape[1]
    mt = num_ways * num_prev

    cap = _vmem_capacity_bytes()
    vmem_limit = (cap * 5) // 8                  # ~40 MiB on v7x, ~80 MiB on v5e/v6e
    if tile_s is None:
        tile_s = _pick_tile_s(S_total, C, hidden, num_prev, num_ways,
                              jnp.dtype(dtype).itemsize,
                              vmem_limit - 4 * 1024 * 1024, B)
    assert S_total % tile_s == 0
    assert tile_s % 128 == 0 or tile_s == S_total

    # Channel-major weight layout (contract over C; spatial stays on lanes).
    # W1 is cast to the activation dtype (bf16 MXU path); W2 stays f32 so the
    # second matmul runs on exact f32 GELU activations.
    w1t = jnp.asarray(w1).T.astype(dtype)                          # (Hd, C)
    b1c = jnp.asarray(b1).reshape(hidden, 1).astype(jnp.float32)   # (Hd, 1)
    w2t = jnp.asarray(w2).T.astype(jnp.float32)                    # (MT, Hd)
    bias2 = (jnp.asarray(b2) + jnp.asarray(sb)).reshape(mt, 1).astype(jnp.float32)

    # NCHW -> (B, C, H*W): pure reshape, no transpose / stack HBM traffic.
    xs_flat = [x.reshape(B, C, S_total) for x in Xs]

    kernel = functools.partial(_da_kernel, num_ways, num_prev)

    xs_specs = [pl.BlockSpec((1, C, tile_s), lambda b, s: (b, 0, s))
                for _ in range(num_prev)]
    w_specs = [
        pl.BlockSpec((hidden, C), lambda b, s: (0, 0)),
        pl.BlockSpec((hidden, 1), lambda b, s: (0, 0)),
        pl.BlockSpec((mt, hidden), lambda b, s: (0, 0)),
        pl.BlockSpec((mt, 1), lambda b, s: (0, 0)),
    ]
    out_specs = [pl.BlockSpec((1, C, tile_s), lambda b, s: (b, 0, s))
                 for _ in range(num_ways)]
    out_shapes = tuple(jax.ShapeDtypeStruct((B, C, S_total), dtype)
                       for _ in range(num_ways))

    outs = pl.pallas_call(
        kernel,
        out_shape=out_shapes,
        grid_spec=pltpu.PrefetchScalarGridSpec(
            num_scalar_prefetch=0,
            grid=(B, S_total // tile_s),
            in_specs=xs_specs + w_specs,
            out_specs=out_specs,
        ),
        compiler_params=pltpu.CompilerParams(
            dimension_semantics=("parallel", "parallel"),
            vmem_limit_bytes=int(vmem_limit)),
    )(*xs_flat, w1t, b1c, w2t, bias2)

    # Free reshapes back to NCHW — matches torch's unbind(dim=1).
    return tuple(o.reshape(B, C, H, W) for o in outs)


def reference(Xs, params, num_ways=4):
    """Pure-JAX reference identical to the PyTorch forward (exact erf GELU)."""
    w1, b1, w2, b2, sb = params
    num_prev = len(Xs)
    B, C, H, W = Xs[-1].shape
    x = jnp.transpose(Xs[-1], (0, 2, 3, 1)).reshape(B, H * W, C)
    h = jax.nn.gelu(x @ w1 + b1, approximate=False)
    logits = (h @ w2 + b2 + sb).reshape(B, H * W, num_ways, num_prev)
    wts = jax.nn.softmax(logits, axis=-1)
    xs = jnp.stack([jnp.transpose(xi, (0, 2, 3, 1)).reshape(B, H * W, C) for xi in Xs],
                   axis=2)                                              # (B, HW, T, C)
    out = jnp.einsum('bsmt,bstc->mbsc', wts, xs)
    out = out.reshape(num_ways, B, H, W, C).transpose(0, 1, 4, 2, 3)
    return tuple(out[m] for m in range(num_ways))


if __name__ == "__main__":
    B, dim, H, W = 2, 32, 16, 16
    layer_idx = 3                      # -> num_prev = 4
    num_ways = 4

    key = jax.random.PRNGKey(0)
    kp, kx = jax.random.split(key)
    params = init_params(kp, dim, layer_idx, num_ways=num_ways)

    xkeys = jax.random.split(kx, layer_idx + 1)
    Xs = [jax.random.normal(k, (B, dim, H, W), jnp.float32) for k in xkeys]

    outs = depthwise_aggregate(Xs, params, num_ways=num_ways)
    outs = jax.block_until_ready(outs)

    refs = reference(Xs, params, num_ways=num_ways)
    for o, r in zip(outs, refs):
        assert o.shape == (B, dim, H, W)
        np.testing.assert_allclose(np.asarray(o), np.asarray(r), rtol=1e-4, atol=1e-4)

    print("KERNEL_OK")
</pallas_src>

<mosaic_0001>
module attributes {stable_mosaic.version = 11 : i64} {
  func.func @_da_kernel(%arg0: i32, %arg1: i32, %arg2: memref<1x32x256xf32, #tpu.memory_space<vmem>>, %arg3: memref<1x32x256xf32, #tpu.memory_space<vmem>>, %arg4: memref<1x32x256xf32, #tpu.memory_space<vmem>>, %arg5: memref<1x32x256xf32, #tpu.memory_space<vmem>>, %arg6: memref<64x32xf32, #tpu.memory_space<vmem>>, %arg7: memref<64x1xf32, #tpu.memory_space<vmem>>, %arg8: memref<16x64xf32, #tpu.memory_space<vmem>>, %arg9: memref<16x1xf32, #tpu.memory_space<vmem>>, %arg10: memref<1x32x256xf32, #tpu.memory_space<vmem>>, %arg11: memref<1x32x256xf32, #tpu.memory_space<vmem>>, %arg12: memref<1x32x256xf32, #tpu.memory_space<vmem>>, %arg13: memref<1x32x256xf32, #tpu.memory_space<vmem>>) attributes {dimension_semantics = [#tpu.dimension_semantics<parallel>, #tpu.dimension_semantics<parallel>], iteration_bounds = array<i64: 2, 1>, scalar_prefetch = 0 : i64, scratch_operands = 0 : i64, tpu.core_type = #tpu.core_type<tc>, window_params = [{transform_indices = @transform_0, window_bounds = array<i64: 1, 32, 256>}, {transform_indices = @transform_1, window_bounds = array<i64: 1, 32, 256>}, {transform_indices = @transform_2, window_bounds = array<i64: 1, 32, 256>}, {transform_indices = @transform_3, window_bounds = array<i64: 1, 32, 256>}, {pipeline_mode = #tpu.pipeline_mode<synchronous>, transform_indices = @transform_4, window_bounds = array<i64: 64, 32>}, {pipeline_mode = #tpu.pipeline_mode<synchronous>, transform_indices = @transform_5, window_bounds = array<i64: 64, 1>}, {pipeline_mode = #tpu.pipeline_mode<synchronous>, transform_indices = @transform_6, window_bounds = array<i64: 16, 64>}, {pipeline_mode = #tpu.pipeline_mode<synchronous>, transform_indices = @transform_7, window_bounds = array<i64: 16, 1>}, {transform_indices = @transform_8, window_bounds = array<i64: 1, 32, 256>}, {transform_indices = @transform_9, window_bounds = array<i64: 1, 32, 256>}, {transform_indices = @transform_10, window_bounds = array<i64: 1, 32, 256>}, {transform_indices = @transform_11, window_bounds = array<i64: 1, 32, 256>}]} {
    %c0 = arith.constant 0 : index
    %c0_0 = arith.constant 0 : index
    %c0_1 = arith.constant 0 : index
    %0 = vector.load %arg5[%c0, %c0_0, %c0_1] : memref<1x32x256xf32, #tpu.memory_space<vmem>>, vector<1x32x256xf32>
    %1 = vector.shape_cast %0 : vector<1x32x256xf32> to vector<32x256xf32>
    %c0_2 = arith.constant 0 : index
    %c0_3 = arith.constant 0 : index
    %2 = vector.load %arg6[%c0_2, %c0_3] : memref<64x32xf32, #tpu.memory_space<vmem>>, vector<64x32xf32>
    %cst = arith.constant dense<0.000000e+00> : vector<64x256xf32>
    %3 = tpu.matmul %2, %1, %cst {dimension_numbers = #tpu.dot_dimension_numbers<[1], [0], [0], [1], [0, 0, 1, 1], [], []>} : vector<64x32xf32>, vector<32x256xf32>, vector<64x256xf32> -> vector<64x256xf32>
    %c0_4 = arith.constant 0 : index
    %c0_5 = arith.constant 0 : index
    %4 = vector.load %arg7[%c0_4, %c0_5] : memref<64x1xf32, #tpu.memory_space<vmem>>, vector<64x1xf32>
    %5 = vector.broadcast %4 : vector<64x1xf32> to vector<64x256xf32>
    %6 = arith.addf %3, %5 : vector<64x256xf32>
    %cst_6 = arith.constant 5.000000e-01 : f32
    %7 = vector.broadcast %cst_6 : f32 to vector<64x256xf32>
    %8 = arith.mulf %7, %6 : vector<64x256xf32>
    %cst_7 = arith.constant 0.707106769 : f32
    %9 = vector.broadcast %cst_7 : f32 to vector<64x256xf32>
    %10 = arith.mulf %6, %9 : vector<64x256xf32>
    %11 = math.absf %10 : vector<64x256xf32>
    %cst_8 = arith.constant 0.327591091 : f32
    %12 = vector.broadcast %cst_8 : f32 to vector<64x256xf32>
    %13 = arith.mulf %12, %11 : vector<64x256xf32>
    %cst_9 = arith.constant 1.000000e+00 : f32
    %14 = vector.broadcast %cst_9 : f32 to vector<64x256xf32>
    %15 = arith.addf %14, %13 : vector<64x256xf32>
    %16 = tpu.reciprocal %15 {approx = true} : vector<64x256xf32> -> vector<64x256xf32>
    %17 = arith.mulf %15, %16 : vector<64x256xf32>
    %cst_10 = arith.constant 2.000000e+00 : f32
    %18 = vector.broadcast %cst_10 : f32 to vector<64x256xf32>
    %19 = arith.subf %18, %17 : vector<64x256xf32>
    %20 = arith.mulf %16, %19 : vector<64x256xf32>
    %cst_11 = arith.constant 1.06140542 : f32
    %21 = vector.broadcast %cst_11 : f32 to vector<64x256xf32>
    %22 = arith.mulf %21, %20 : vector<64x256xf32>
    %cst_12 = arith.constant -1.45315206 : f32
    %23 = vector.broadcast %cst_12 : f32 to vector<64x256xf32>
    %24 = arith.addf %22, %23 : vector<64x256xf32>
    %25 = arith.mulf %24, %20 : vector<64x256xf32>
    %cst_13 = arith.constant 1.42141378 : f32
    %26 = vector.broadcast %cst_13 : f32 to vector<64x256xf32>
    %27 = arith.addf %25, %26 : vector<64x256xf32>
    %28 = arith.mulf %27, %20 : vector<64x256xf32>
    %cst_14 = arith.constant -0.284496725 : f32
    %29 = vector.broadcast %cst_14 : f32 to vector<64x256xf32>
    %30 = arith.addf %28, %29 : vector<64x256xf32>
    %31 = arith.mulf %30, %20 : vector<64x256xf32>
    %cst_15 = arith.constant 0.254829586 : f32
    %32 = vector.broadcast %cst_15 : f32 to vector<64x256xf32>
    %33 = arith.addf %31, %32 : vector<64x256xf32>
    %34 = arith.mulf %33, %20 : vector<64x256xf32>
    %cst_16 = arith.constant 0.000000e+00 : f32
    %35 = vector.broadcast %cst_16 : f32 to vector<64x256xf32>
    %36 = arith.subf %35, %11 : vector<64x256xf32>
    %37 = arith.mulf %36, %11 : vector<64x256xf32>
    %38 = math.exp %37 : vector<64x256xf32>
    %39 = arith.mulf %34, %38 : vector<64x256xf32>
    %cst_17 = arith.constant 1.000000e+00 : f32
    %40 = vector.broadcast %cst_17 : f32 to vector<64x256xf32>
    %41 = arith.subf %40, %39 : vector<64x256xf32>
    %cst_18 = arith.constant 0.000000e+00 : f32
    %42 = vector.broadcast %cst_18 : f32 to vector<64x256xf32>
    %43 = arith.cmpf oge, %10, %42 : vector<64x256xf32>
    %cst_19 = arith.constant 0.000000e+00 : f32
    %44 = vector.broadcast %cst_19 : f32 to vector<64x256xf32>
    %45 = arith.subf %44, %41 : vector<64x256xf32>
    %46 = arith.select %43, %41, %45 : vector<64x256xi1>, vector<64x256xf32>
    %cst_20 = arith.constant 1.000000e+00 : f32
    %47 = vector.broadcast %cst_20 : f32 to vector<64x256xf32>
    %48 = arith.addf %47, %46 : vector<64x256xf32>
    %49 = arith.mulf %8, %48 : vector<64x256xf32>
    %c0_21 = arith.constant 0 : index
    %c0_22 = arith.constant 0 : index
    %50 = vector.load %arg8[%c0_21, %c0_22] : memref<16x64xf32, #tpu.memory_space<vmem>>, vector<16x64xf32>
    %cst_23 = arith.constant dense<0.000000e+00> : vector<16x256xf32>
    %51 = tpu.matmul %50, %49, %cst_23 {dimension_numbers = #tpu.dot_dimension_numbers<[1], [0], [0], [1], [0, 0, 1, 1], [], []>} : vector<16x64xf32>, vector<64x256xf32>, vector<16x256xf32> -> vector<16x256xf32>
    %c0_24 = arith.constant 0 : index
    %c0_25 = arith.constant 0 : index
    %52 = vector.load %arg9[%c0_24, %c0_25] : memref<16x1xf32, #tpu.memory_space<vmem>>, vector<16x1xf32>
    %53 = vector.broadcast %52 : vector<16x1xf32> to vector<16x256xf32>
    %54 = arith.addf %51, %53 : vector<16x256xf32>
    %55 = vector.extract_strided_slice %54 {offsets = [0, 0], sizes = [4, 256], strides = [1, 1]} : vector<16x256xf32> to vector<4x256xf32>
    %cst_26 = arith.constant dense<0xFF800000> : vector<256xf32>
    %56 = vector.multi_reduction <maximumf>, %55, %cst_26 [0] : vector<4x256xf32> to vector<256xf32>
    %57 = vector.shape_cast %56 : vector<256xf32> to vector<1x256xf32>
    %58 = vector.broadcast %57 : vector<1x256xf32> to vector<4x256xf32>
    %59 = arith.subf %55, %58 : vector<4x256xf32>
    %60 = math.exp %59 : vector<4x256xf32>
    %cst_27 = arith.constant dense<0.000000e+00> : vector<256xf32>
    %61 = vector.multi_reduction <add>, %60, %cst_27 [0] : vector<4x256xf32> to vector<256xf32>
    %62 = vector.shape_cast %61 : vector<256xf32> to vector<1x256xf32>
    %63 = tpu.reciprocal %62 {approx = true} : vector<1x256xf32> -> vector<1x256xf32>
    %64 = arith.mulf %62, %63 : vector<1x256xf32>
    %cst_28 = arith.constant 2.000000e+00 : f32
    %65 = vector.broadcast %cst_28 : f32 to vector<1x256xf32>
    %66 = arith.subf %65, %64 : vector<1x256xf32>
    %67 = arith.mulf %63, %66 : vector<1x256xf32>
    %68 = vector.broadcast %67 : vector<1x256xf32> to vector<4x256xf32>
    %69 = arith.mulf %60, %68 : vector<4x256xf32>
    %70 = vector.extract_strided_slice %54 {offsets = [4, 0], sizes = [4, 256], strides = [1, 1]} : vector<16x256xf32> to vector<4x256xf32>
    %cst_29 = arith.constant dense<0xFF800000> : vector<256xf32>
    %71 = vector.multi_reduction <maximumf>, %70, %cst_29 [0] : vector<4x256xf32> to vector<256xf32>
    %72 = vector.shape_cast %71 : vector<256xf32> to vector<1x256xf32>
    %73 = vector.broadcast %72 : vector<1x256xf32> to vector<4x256xf32>
    %74 = arith.subf %70, %73 : vector<4x256xf32>
    %75 = math.exp %74 : vector<4x256xf32>
    %cst_30 = arith.constant dense<0.000000e+00> : vector<256xf32>
    %76 = vector.multi_reduction <add>, %75, %cst_30 [0] : vector<4x256xf32> to vector<256xf32>
    %77 = vector.shape_cast %76 : vector<256xf32> to vector<1x256xf32>
    %78 = tpu.reciprocal %77 {approx = true} : vector<1x256xf32> -> vector<1x256xf32>
    %79 = arith.mulf %77, %78 : vector<1x256xf32>
    %cst_31 = arith.constant 2.000000e+00 : f32
    %80 = vector.broadcast %cst_31 : f32 to vector<1x256xf32>
    %81 = arith.subf %80, %79 : vector<1x256xf32>
    %82 = arith.mulf %78, %81 : vector<1x256xf32>
    %83 = vector.broadcast %82 : vector<1x256xf32> to vector<4x256xf32>
    %84 = arith.mulf %75, %83 : vector<4x256xf32>
    %85 = vector.extract_strided_slice %54 {offsets = [8, 0], sizes = [4, 256], strides = [1, 1]} : vector<16x256xf32> to vector<4x256xf32>
    %cst_32 = arith.constant dense<0xFF800000> : vector<256xf32>
    %86 = vector.multi_reduction <maximumf>, %85, %cst_32 [0] : vector<4x256xf32> to vector<256xf32>
    %87 = vector.shape_cast %86 : vector<256xf32> to vector<1x256xf32>
    %88 = vector.broadcast %87 : vector<1x256xf32> to vector<4x256xf32>
    %89 = arith.subf %85, %88 : vector<4x256xf32>
    %90 = math.exp %89 : vector<4x256xf32>
    %cst_33 = arith.constant dense<0.000000e+00> : vector<256xf32>
    %91 = vector.multi_reduction <add>, %90, %cst_33 [0] : vector<4x256xf32> to vector<256xf32>
    %92 = vector.shape_cast %91 : vector<256xf32> to vector<1x256xf32>
    %93 = tpu.reciprocal %92 {approx = true} : vector<1x256xf32> -> vector<1x256xf32>
    %94 = arith.mulf %92, %93 : vector<1x256xf32>
    %cst_34 = arith.constant 2.000000e+00 : f32
    %95 = vector.broadcast %cst_34 : f32 to vector<1x256xf32>
    %96 = arith.subf %95, %94 : vector<1x256xf32>
    %97 = arith.mulf %93, %96 : vector<1x256xf32>
    %98 = vector.broadcast %97 : vector<1x256xf32> to vector<4x256xf32>
    %99 = arith.mulf %90, %98 : vector<4x256xf32>
    %100 = vector.extract_strided_slice %54 {offsets = [12, 0], sizes = [4, 256], strides = [1, 1]} : vector<16x256xf32> to vector<4x256xf32>
    %cst_35 = arith.constant dense<0xFF800000> : vector<256xf32>
    %101 = vector.multi_reduction <maximumf>, %100, %cst_35 [0] : vector<4x256xf32> to vector<256xf32>
    %102 = vector.shape_cast %101 : vector<256xf32> to vector<1x256xf32>
    %103 = vector.broadcast %102 : vector<1x256xf32> to vector<4x256xf32>
    %104 = arith.subf %100, %103 : vector<4x256xf32>
    %105 = math.exp %104 : vector<4x256xf32>
    %cst_36 = arith.constant dense<0.000000e+00> : vector<256xf32>
    %106 = vector.multi_reduction <add>, %105, %cst_36 [0] : vector<4x256xf32> to vector<256xf32>
    %107 = vector.shape_cast %106 : vector<256xf32> to vector<1x256xf32>
    %108 = tpu.reciprocal %107 {approx = true} : vector<1x256xf32> -> vector<1x256xf32>
    %109 = arith.mulf %107, %108 : vector<1x256xf32>
    %cst_37 = arith.constant 2.000000e+00 : f32
    %110 = vector.broadcast %cst_37 : f32 to vector<1x256xf32>
    %111 = arith.subf %110, %109 : vector<1x256xf32>
    %112 = arith.mulf %108, %111 : vector<1x256xf32>
    %113 = vector.broadcast %112 : vector<1x256xf32> to vector<4x256xf32>
    %114 = arith.mulf %105, %113 : vector<4x256xf32>
    %115 = vector.extract_strided_slice %69 {offsets = [0, 0], sizes = [1, 256], strides = [1, 1]} : vector<4x256xf32> to vector<1x256xf32>
    %c0_38 = arith.constant 0 : index
    %c0_39 = arith.constant 0 : index
    %c0_40 = arith.constant 0 : index
    %116 = vector.load %arg2[%c0_38, %c0_39, %c0_40] : memref<1x32x256xf32, #tpu.memory_space<vmem>>, vector<1x32x256xf32>
    %117 = vector.shape_cast %116 : vector<1x32x256xf32> to vector<32x256xf32>
    %118 = vector.broadcast %115 : vector<1x256xf32> to vector<32x256xf32>
    %119 = arith.mulf %118, %117 : vector<32x256xf32>
    %120 = vector.extract_strided_slice %69 {offsets = [1, 0], sizes = [1, 256], strides = [1, 1]} : vector<4x256xf32> to vector<1x256xf32>
    %c0_41 = arith.constant 0 : index
    %c0_42 = arith.constant 0 : index
    %c0_43 = arith.constant 0 : index
    %121 = vector.load %arg3[%c0_41, %c0_42, %c0_43] : memref<1x32x256xf32, #tpu.memory_space<vmem>>, vector<1x32x256xf32>
    %122 = vector.shape_cast %121 : vector<1x32x256xf32> to vector<32x256xf32>
    %123 = vector.broadcast %120 : vector<1x256xf32> to vector<32x256xf32>
    %124 = arith.mulf %123, %122 : vector<32x256xf32>
    %125 = arith.addf %119, %124 : vector<32x256xf32>
    %126 = vector.extract_strided_slice %69 {offsets = [2, 0], sizes = [1, 256], strides = [1, 1]} : vector<4x256xf32> to vector<1x256xf32>
    %c0_44 = arith.constant 0 : index
    %c0_45 = arith.constant 0 : index
    %c0_46 = arith.constant 0 : index
    %127 = vector.load %arg4[%c0_44, %c0_45, %c0_46] : memref<1x32x256xf32, #tpu.memory_space<vmem>>, vector<1x32x256xf32>
    %128 = vector.shape_cast %127 : vector<1x32x256xf32> to vector<32x256xf32>
    %129 = vector.broadcast %126 : vector<1x256xf32> to vector<32x256xf32>
    %130 = arith.mulf %129, %128 : vector<32x256xf32>
    %131 = arith.addf %125, %130 : vector<32x256xf32>
    %132 = vector.extract_strided_slice %69 {offsets = [3, 0], sizes = [1, 256], strides = [1, 1]} : vector<4x256xf32> to vector<1x256xf32>
    %c0_47 = arith.constant 0 : index
    %c0_48 = arith.constant 0 : index
    %c0_49 = arith.constant 0 : index
    %133 = vector.load %arg5[%c0_47, %c0_48, %c0_49] : memref<1x32x256xf32, #tpu.memory_space<vmem>>, vector<1x32x256xf32>
    %134 = vector.shape_cast %133 : vector<1x32x256xf32> to vector<32x256xf32>
    %135 = vector.broadcast %132 : vector<1x256xf32> to vector<32x256xf32>
    %136 = arith.mulf %135, %134 : vector<32x256xf32>
    %137 = arith.addf %131, %136 : vector<32x256xf32>
    %c0_50 = arith.constant 0 : index
    %c0_51 = arith.constant 0 : index
    %c0_52 = arith.constant 0 : index
    %138 = vector.load %arg10[%c0_50, %c0_51, %c0_52] : memref<1x32x256xf32, #tpu.memory_space<vmem>>, vector<1x32x256xf32>
    %139 = vector.shape_cast %138 : vector<1x32x256xf32> to vector<32x256xf32>
    %140 = vector.shape_cast %137 : vector<32x256xf32> to vector<1x32x256xf32>
    tpu.vector_store %arg10[%c0_50, %c0_51, %c0_52], %140 {strides = array<i32>} : memref<1x32x256xf32, #tpu.memory_space<vmem>>, vector<1x32x256xf32>,
    %141 = vector.extract_strided_slice %84 {offsets = [0, 0], sizes = [1, 256], strides = [1, 1]} : vector<4x256xf32> to vector<1x256xf32>
    %c0_53 = arith.constant 0 : index
    %c0_54 = arith.constant 0 : index
    %c0_55 = arith.constant 0 : index
    %142 = vector.load %arg2[%c0_53, %c0_54, %c0_55] : memref<1x32x256xf32, #tpu.memory_space<vmem>>, vector<1x32x256xf32>
    %143 = vector.shape_cast %142 : vector<1x32x256xf32> to vector<32x256xf32>
    %144 = vector.broadcast %141 : vector<1x256xf32> to vector<32x256xf32>
    %145 = arith.mulf %144, %143 : vector<32x256xf32>
    %146 = vector.extract_strided_slice %84 {offsets = [1, 0], sizes = [1, 256], strides = [1, 1]} : vector<4x256xf32> to vector<1x256xf32>
    %c0_56 = arith.constant 0 : index
    %c0_57 = arith.constant 0 : index
    %c0_58 = arith.constant 0 : index
    %147 = vector.load %arg3[%c0_56, %c0_57, %c0_58] : memref<1x32x256xf32, #tpu.memory_space<vmem>>, vector<1x32x256xf32>
    %148 = vector.shape_cast %147 : vector<1x32x256xf32> to vector<32x256xf32>
    %149 = vector.broadcast %146 : vector<1x256xf32> to vector<32x256xf32>
    %150 = arith.mulf %149, %148 : vector<32x256xf32>
    %151 = arith.addf %145, %150 : vector<32x256xf32>
    %152 = vector.extract_strided_slice %84 {offsets = [2, 0], sizes = [1, 256], strides = [1, 1]} : vector<4x256xf32> to vector<1x256xf32>
    %c0_59 = arith.constant 0 : index
    %c0_60 = arith.constant 0 : index
    %c0_61 = arith.constant 0 : index
    %153 = vector.load %arg4[%c0_59, %c0_60, %c0_61] : memref<1x32x256xf32, #tpu.memory_space<vmem>>, vector<1x32x256xf32>
    %154 = vector.shape_cast %153 : vector<1x32x256xf32> to vector<32x256xf32>
    %155 = vector.broadcast %152 : vector<1x256xf32> to vector<32x256xf32>
    %156 = arith.mulf %155, %154 : vector<32x256xf32>
    %157 = arith.addf %151, %156 : vector<32x256xf32>
    %158 = vector.extract_strided_slice %84 {offsets = [3, 0], sizes = [1, 256], strides = [1, 1]} : vector<4x256xf32> to vector<1x256xf32>
    %c0_62 = arith.constant 0 : index
    %c0_63 = arith.constant 0 : index
    %c0_64 = arith.constant 0 : index
    %159 = vector.load %arg5[%c0_62, %c0_63, %c0_64] : memref<1x32x256xf32, #tpu.memory_space<vmem>>, vector<1x32x256xf32>
    %160 = vector.shape_cast %159 : vector<1x32x256xf32> to vector<32x256xf32>
    %161 = vector.broadcast %158 : vector<1x256xf32> to vector<32x256xf32>
    %162 = arith.mulf %161, %160 : vector<32x256xf32>
    %163 = arith.addf %157, %162 : vector<32x256xf32>
    %c0_65 = arith.constant 0 : index
    %c0_66 = arith.constant 0 : index
    %c0_67 = arith.constant 0 : index
    %164 = vector.load %arg11[%c0_65, %c0_66, %c0_67] : memref<1x32x256xf32, #tpu.memory_space<vmem>>, vector<1x32x256xf32>
    %165 = vector.shape_cast %164 : vector<1x32x256xf32> to vector<32x256xf32>
    %166 = vector.shape_cast %163 : vector<32x256xf32> to vector<1x32x256xf32>
    tpu.vector_store %arg11[%c0_65, %c0_66, %c0_67], %166 {strides = array<i32>} : memref<1x32x256xf32, #tpu.memory_space<vmem>>, vector<1x32x256xf32>,
    %167 = vector.extract_strided_slice %99 {offsets = [0, 0], sizes = [1, 256], strides = [1, 1]} : vector<4x256xf32> to vector<1x256xf32>
    %c0_68 = arith.constant 0 : index
    %c0_69 = arith.constant 0 : index
    %c0_70 = arith.constant 0 : index
    %168 = vector.load %arg2[%c0_68, %c0_69, %c0_70] : memref<1x32x256xf32, #tpu.memory_space<vmem>>, vector<1x32x256xf32>
    %169 = vector.shape_cast %168 : vector<1x32x256xf32> to vector<32x256xf32>
    %170 = vector.broadcast %167 : vector<1x256xf32> to vector<32x256xf32>
    %171 = arith.mulf %170, %169 : vector<32x256xf32>
    %172 = vector.extract_strided_slice %99 {offsets = [1, 0], sizes = [1, 256], strides = [1, 1]} : vector<4x256xf32> to vector<1x256xf32>
    %c0_71 = arith.constant 0 : index
    %c0_72 = arith.constant 0 : index
    %c0_73 = arith.constant 0 : index
    %173 = vector.load %arg3[%c0_71, %c0_72, %c0_73] : memref<1x32x256xf32, #tpu.memory_space<vmem>>, vector<1x32x256xf32>
    %174 = vector.shape_cast %173 : vector<1x32x256xf32> to vector<32x256xf32>
    %175 = vector.broadcast %172 : vector<1x256xf32> to vector<32x256xf32>
    %176 = arith.mulf %175, %174 : vector<32x256xf32>
    %177 = arith.addf %171, %176 : vector<32x256xf32>
    %178 = vector.extract_strided_slice %99 {offsets = [2, 0], sizes = [1, 256], strides = [1, 1]} : vector<4x256xf32> to vector<1x256xf32>
    %c0_74 = arith.constant 0 : index
    %c0_75 = arith.constant 0 : index
    %c0_76 = arith.constant 0 : index
    %179 = vector.load %arg4[%c0_74, %c0_75, %c0_76] : memref<1x32x256xf32, #tpu.memory_space<vmem>>, vector<1x32x256xf32>
    %180 = vector.shape_cast %179 : vector<1x32x256xf32> to vector<32x256xf32>
    %181 = vector.broadcast %178 : vector<1x256xf32> to vector<32x256xf32>
    %182 = arith.mulf %181, %180 : vector<32x256xf32>
    %183 = arith.addf %177, %182 : vector<32x256xf32>
    %184 = vector.extract_strided_slice %99 {offsets = [3, 0], sizes = [1, 256], strides = [1, 1]} : vector<4x256xf32> to vector<1x256xf32>
    %c0_77 = arith.constant 0 : index
    %c0_78 = arith.constant 0 : index
    %c0_79 = arith.constant 0 : index
    %185 = vector.load %arg5[%c0_77, %c0_78, %c0_79] : memref<1x32x256xf32, #tpu.memory_space<vmem>>, vector<1x32x256xf32>
    %186 = vector.shape_cast %185 : vector<1x32x256xf32> to vector<32x256xf32>
    %187 = vector.broadcast %184 : vector<1x256xf32> to vector<32x256xf32>
    %188 = arith.mulf %187, %186 : vector<32x256xf32>
    %189 = arith.addf %183, %188 : vector<32x256xf32>
    %c0_80 = arith.constant 0 : index
    %c0_81 = arith.constant 0 : index
    %c0_82 = arith.constant 0 : index
    %190 = vector.load %arg12[%c0_80, %c0_81, %c0_82] : memref<1x32x256xf32, #tpu.memory_space<vmem>>, vector<1x32x256xf32>
    %191 = vector.shape_cast %190 : vector<1x32x256xf32> to vector<32x256xf32>
    %192 = vector.shape_cast %189 : vector<32x256xf32> to vector<1x32x256xf32>
    tpu.vector_store %arg12[%c0_80, %c0_81, %c0_82], %192 {strides = array<i32>} : memref<1x32x256xf32, #tpu.memory_space<vmem>>, vector<1x32x256xf32>,
    %193 = vector.extract_strided_slice %114 {offsets = [0, 0], sizes = [1, 256], strides = [1, 1]} : vector<4x256xf32> to vector<1x256xf32>
    %c0_83 = arith.constant 0 : index
    %c0_84 = arith.constant 0 : index
    %c0_85 = arith.constant 0 : index
    %194 = vector.load %arg2[%c0_83, %c0_84, %c0_85] : memref<1x32x256xf32, #tpu.memory_space<vmem>>, vector<1x32x256xf32>
    %195 = vector.shape_cast %194 : vector<1x32x256xf32> to vector<32x256xf32>
    %196 = vector.broadcast %193 : vector<1x256xf32> to vector<32x256xf32>
    %197 = arith.mulf %196, %195 : vector<32x256xf32>
    %198 = vector.extract_strided_slice %114 {offsets = [1, 0], sizes = [1, 256], strides = [1, 1]} : vector<4x256xf32> to vector<1x256xf32>
    %c0_86 = arith.constant 0 : index
    %c0_87 = arith.constant 0 : index
    %c0_88 = arith.constant 0 : index
    %199 = vector.load %arg3[%c0_86, %c0_87, %c0_88] : memref<1x32x256xf32, #tpu.memory_space<vmem>>, vector<1x32x256xf32>
    %200 = vector.shape_cast %199 : vector<1x32x256xf32> to vector<32x256xf32>
    %201 = vector.broadcast %198 : vector<1x256xf32> to vector<32x256xf32>
    %202 = arith.mulf %201, %200 : vector<32x256xf32>
    %203 = arith.addf %197, %202 : vector<32x256xf32>
    %204 = vector.extract_strided_slice %114 {offsets = [2, 0], sizes = [1, 256], strides = [1, 1]} : vector<4x256xf32> to vector<1x256xf32>
    %c0_89 = arith.constant 0 : index
    %c0_90 = arith.constant 0 : index
    %c0_91 = arith.constant 0 : index
    %205 = vector.load %arg4[%c0_89, %c0_90, %c0_91] : memref<1x32x256xf32, #tpu.memory_space<vmem>>, vector<1x32x256xf32>
    %206 = vector.shape_cast %205 : vector<1x32x256xf32> to vector<32x256xf32>
    %207 = vector.broadcast %204 : vector<1x256xf32> to vector<32x256xf32>
    %208 = arith.mulf %207, %206 : vector<32x256xf32>
    %209 = arith.addf %203, %208 : vector<32x256xf32>
    %210 = vector.extract_strided_slice %114 {offsets = [3, 0], sizes = [1, 256], strides = [1, 1]} : vector<4x256xf32> to vector<1x256xf32>
    %c0_92 = arith.constant 0 : index
    %c0_93 = arith.constant 0 : index
    %c0_94 = arith.constant 0 : index
    %211 = vector.load %arg5[%c0_92, %c0_93, %c0_94] : memref<1x32x256xf32, #tpu.memory_space<vmem>>, vector<1x32x256xf32>
    %212 = vector.shape_cast %211 : vector<1x32x256xf32> to vector<32x256xf32>
    %213 = vector.broadcast %210 : vector<1x256xf32> to vector<32x256xf32>
    %214 = arith.mulf %213, %212 : vector<32x256xf32>
    %215 = arith.addf %209, %214 : vector<32x256xf32>
    %c0_95 = arith.constant 0 : index
    %c0_96 = arith.constant 0 : index
    %c0_97 = arith.constant 0 : index
    %216 = vector.load %arg13[%c0_95, %c0_96, %c0_97] : memref<1x32x256xf32, #tpu.memory_space<vmem>>, vector<1x32x256xf32>
    %217 = vector.shape_cast %216 : vector<1x32x256xf32> to vector<32x256xf32>
    %218 = vector.shape_cast %215 : vector<32x256xf32> to vector<1x32x256xf32>
    tpu.vector_store %arg13[%c0_95, %c0_96, %c0_97], %218 {strides = array<i32>} : memref<1x32x256xf32, #tpu.memory_space<vmem>>, vector<1x32x256xf32>,
    return
  }
  func.func @transform_0(%arg0: i32, %arg1: i32) -> (i32, i32, i32) {
    %c0_i32 = arith.constant 0 : i32
    %c0_i32_0 = arith.constant 0 : i32
    return %arg0, %c0_i32, %arg1 : i32, i32, i32
  }
  func.func @transform_1(%arg0: i32, %arg1: i32) -> (i32, i32, i32) {
    %c0_i32 = arith.constant 0 : i32
    %c0_i32_0 = arith.constant 0 : i32
    return %arg0, %c0_i32, %arg1 : i32, i32, i32
  }
  func.func @transform_2(%arg0: i32, %arg1: i32) -> (i32, i32, i32) {
    %c0_i32 = arith.constant 0 : i32
    %c0_i32_0 = arith.constant 0 : i32
    return %arg0, %c0_i32, %arg1 : i32, i32, i32
  }
  func.func @transform_3(%arg0: i32, %arg1: i32) -> (i32, i32, i32) {
    %c0_i32 = arith.constant 0 : i32
    %c0_i32_0 = arith.constant 0 : i32
    return %arg0, %c0_i32, %arg1 : i32, i32, i32
  }
  func.func @transform_4(%arg0: i32, %arg1: i32) -> (i32, i32) {
    %c0_i32 = arith.constant 0 : i32
    %c0_i32_0 = arith.constant 0 : i32
    %c0_i32_1 = arith.constant 0 : i32
    return %c0_i32, %c0_i32_0 : i32, i32
  }
  func.func @transform_5(%arg0: i32, %arg1: i32) -> (i32, i32) {
    %c0_i32 = arith.constant 0 : i32
    %c0_i32_0 = arith.constant 0 : i32
    %c0_i32_1 = arith.constant 0 : i32
    return %c0_i32, %c0_i32_0 : i32, i32
  }
  func.func @transform_6(%arg0: i32, %arg1: i32) -> (i32, i32) {
    %c0_i32 = arith.constant 0 : i32
    %c0_i32_0 = arith.constant 0 : i32
    %c0_i32_1 = arith.constant 0 : i32
    return %c0_i32, %c0_i32_0 : i32, i32
  }
  func.func @transform_7(%arg0: i32, %arg1: i32) -> (i32, i32) {
    %c0_i32 = arith.constant 0 : i32
    %c0_i32_0 = arith.constant 0 : i32
    %c0_i32_1 = arith.constant 0 : i32
    return %c0_i32, %c0_i32_0 : i32, i32
  }
  func.func @transform_8(%arg0: i32, %arg1: i32) -> (i32, i32, i32) {
    %c0_i32 = arith.constant 0 : i32
    %c0_i32_0 = arith.constant 0 : i32
    return %arg0, %c0_i32, %arg1 : i32, i32, i32
  }
  func.func @transform_9(%arg0: i32, %arg1: i32) -> (i32, i32, i32) {
    %c0_i32 = arith.constant 0 : i32
    %c0_i32_0 = arith.constant 0 : i32
    return %arg0, %c0_i32, %arg1 : i32, i32, i32
  }
  func.func @transform_10(%arg0: i32, %arg1: i32) -> (i32, i32, i32) {
    %c0_i32 = arith.constant 0 : i32
    %c0_i32_0 = arith.constant 0 : i32
    return %arg0, %c0_i32, %arg1 : i32, i32, i32
  }
  func.func @transform_11(%arg0: i32, %arg1: i32) -> (i32, i32, i32) {
    %c0_i32 = arith.constant 0 : i32
    %c0_i32_0 = arith.constant 0 : i32
    return %arg0, %c0_i32, %arg1 : i32, i32, i32
  }
}

</mosaic_0001>

<bundles_post_ra>
// kernel: tpu_custom_call.1
= control target key start
LH: loop header
LB: loop body
LE: loop exit
PB: predicated region body
PF: predicated region fallthrough
CT: control target
= control target key end

     0   :  { %s4242_s0 = inlined_call_operand.vmem [shape: f32[2,32,256], index: 0, kind: input, shape index: {}]   ;;  %s4243_s1 = inlined_call_operand.hbm [shape: f32[2,32,256], index: 1, kind: input, shape index: {}]   ;;  %s4244_s2 = inlined_call_operand.hbm [shape: f32[2,32,256], index: 2, kind: input, shape index: {}]   ;;  %s4245_s3 = inlined_call_operand.hbm [shape: f32[2,32,256], index: 3, kind: input, shape index: {}]   ;;  %s4246_s4 = inlined_call_operand.vmem [shape: f32[64,32], index: 4, kind: input, shape index: {}]   ;;  %s4247_s5 = inlined_call_operand.vmem [shape: f32[64,1], index: 5, kind: input, shape index: {}]   ;;  %s4248_s6 = inlined_call_operand.vmem [shape: f32[16,64], index: 6, kind: input, shape index: {}]   ;;  %s4249_s7 = inlined_call_operand.vmem [shape: f32[16,1], index: 7, kind: input, shape index: {}]   ;;  %s4250_s8 = inlined_call_operand.hbm [shape: f32[2,32,256], index: 8, kind: output, shape index: {0}]   ;;  %s4251_s9 = inlined_call_operand.hbm [shape: f32[2,32,256], index: 9, kind: output, shape index: {1}]   ;;  %s4252_s10 = inlined_call_operand.hbm [shape: f32[2,32,256], index: 10, kind: output, shape index: {2}]   ;;  %s4253_s11 = inlined_call_operand.hbm [shape: f32[2,32,256], index: 11, kind: output, shape index: {3}]  }
   0x1   :  { %4306 = sst [smem:[#allocation45_spill]] %s4242_s0 }
   0x2   :  { %4307 = sst [smem:[#allocation46_spill]] %s4244_s2 }
   0x3   :  { %4308 = sst [smem:[#allocation47_spill]] %s4250_s8 }
   0x4   :  { %4309 = sst [smem:[#allocation48_spill]] %s4251_s9 }
   0x5   :  { %4310 = sst [smem:[#allocation49_spill]] %s4252_s10 }
   0x6   :  { %4311 = sst [smem:[#allocation50_spill]] %s4253_s11 }
   0x7   :  { %17 = vsyncpa [#allocation3], 0 }
   0x8   :  { %19 = vsyncpa [#allocation3 + $0x1], 0 }
   0x9   :  { %20 = vsyncpa [#allocation6], 0 }
   0xa   :  { %22 = vsyncpa [#allocation6 + $0x1], 0 }
   0xb   :  { %23 = vsyncpa [#allocation4], 0 }
   0xc   :  { %25 = vsyncpa [#allocation4 + $0x1], 0 }
   0xd   :  { %26 = vsyncpa [#allocation10], 0 }
   0xe   :  { %28 = vsyncpa [#allocation10 + $0x1], 0 }
   0xf   :  { %29 = vsyncpa [#allocation13], 0 }
  0x10   :  { %31 = vsyncpa [#allocation13 + $0x1], 0  ;;  %s2967_s17 = smov 0   ;;  %s2969_s18 = smov 0  }
  0x11   :  { %s2971_s19 = smov 0   ;;  %s2973_s20 = smov 0  }
  0x12   :  { %s2975_s21 = smov 0   ;;  %s2977_s22 = smov 0  }
  0x13 LB: > { %4312 = sst [smem:[#allocation19_spill]] %s2872_s17  ;;  %s2998_s23 = sadd.s32 4294967295, %s2892_s22   ;;  %s2892_s22 = sphi %s2977_s22, %s37_s22   ;;  %s2888_s21 = sphi %s2975_s21, %s4411_s21   ;;  %s2884_s20 = sphi %s2973_s20, %s4410_s20   ;;  %s2880_s19 = sphi %s2971_s19, %s4414_s19   ;;  %s2876_s18 = sphi %s2969_s18, %s4413_s18   ;;  %s2872_s17 = sphi %s2967_s17, %s4412_s17  }
  0x14   : > { %4313 = sst [smem:[#allocation20_spill]] %s2888_s21  ;;  %s4254_s24 = sadd.s32 4294967294, %s2892_s22  }
  0x15   : > { %s49_s25 = sadd.s32 1, %s2888_s21  ;;  %s86_s26 = sadd.s32 1, %s2880_s19 }
  0x16   : > { %p51_p0 = scmp.ge.s32.totalorder %s49_s25, 2  ;;  %p93_p1 = scmp.ne.s32.totalorder %s2880_s19, %s2876_s18 }
  0x17   : > { %p94_p2 = scmp.eq.s32.totalorder %s2892_s22, 0  ;;  %p99_p3 = scmp.ne.s32.totalorder %s2876_s18, %s2872_s17 }
  0x18   : > { %s4416_s25 = smov (%p51_p0, %s49_s25), 0  ;;  %p100_p5 = scmp.eq.s32.totalorder %s2998_s23, 0 }
  0x19   : > { %4314 = sst [smem:[#allocation21_spill]] %s4416_s25  ;;  %p3010_p4 = por %p94_p2, %p93_p1 }
  0x1a   : > { %s81_s28 = ssub.s32 %s2888_s21, %s4416_s25  ;;  %p265_p6 = scmp.eq.s32.totalorder %s2998_s23, 1 }
  0x1b   : > { %p84_p7 = scmp.eq.s32.totalorder %s81_s28, 0  ;;  %p3018_p8 = por %p100_p5, %p99_p3 }
  0x1c   : > { %p3022_p9 = por %p265_p6, %p93_p1  ;;  %p271_p10 = scmp.eq.s32.totalorder %s4254_s24, 1 }
  0x1d   : > { %s3029_s12 = scalar_select %p84_p7, %s2880_s19, %s86_s26  }
  0x1e   : > { %s4317_s30 = scalar_select %p3022_p9, 1, 0 }
  0x1f   : > { %4319 = sst [smem:[#allocation23_spill]] %s3029_s12  ;;  %p3031_p11 = por %p271_p10, %p99_p3 }
  0x20   : > { %4318 = sst [smem:[#allocation22_spill]] %s4317_s30  ;;  %p2476_p13 = scmp.lt.s32.totalorder %s2892_s22, 2 }
  0x21   : > { %s4320_s13 = scalar_select %p3031_p11, 1, 0 }
  0x22   : > { %s4258_s14 = sand.u32 1, %s2880_s19   ;;  %s3043_s16 = sshll.u32 %s2888_s21, 10 }
  0x23   : > { %4321 = sst [smem:[#allocation24_spill]] %s4320_s13  ;;  %s3040_s15 = sshll.u32 %s4258_s14, 6 }
  0x24   : > { %p3047_p0 = pnand %p2476_p13, %p3010_p4  ;;  %s423_s26 = sand.u32 1, %s2892_s22  }
  0x25   : > { %s4323_s2 = sld [smem:[#allocation46_spill]]  ;;  %s427_s13 = scalar_lea.vmem [#allocation5], %s3040_s15 }
  0x26   : > { %s436_s17 = sshll.u32 %s427_s13, 4  ;;  %p2397_p1 = scmp.ge.s32.totalorder %s2892_s22, 1  ;;  %s437_s17 = int_to_ptr.vmem [resolvable:$true] %s436_s17 }
  0x27   : > { %p467_p2 = scmp.lt.s32.totalorder %s2892_s22, 3  ;;  %s3059_s14 = scalar_lea.sflag [#allocation6], %s423_s26 }
  0x28   : > { %p2640_p3 = pneg %p3047_p0  ;;  %s2651_s27 = scalar_lea.vmem %s437_s17, 1024 }
  0x29   : > { %p2652_p4 = scmp.ne.s32.totalorder %s437_s17, %s2651_s27  ;;  %s2894_s21 = smov [#allocation5]  }
  0x2a   : > { %s2656_s11 = sshll.u32 %s2894_s21, 4  ;;  %s2657_s11 = int_to_ptr.vmem [resolvable:$false] %s2656_s11 }
  0x2b   : > { %s435_s12 = scalar_lea.hbm %s4323_s2, %s3043_s16  ;;  %p2654_p5 = pnand %p2652_p4, %p2640_p3 }
  0x2c   : > { %s2658_s24 = scalar_lea.vmem %s2657_s11, 2048  ;;  %p2659_p7 = scmp.lt.s32.totalorder %s437_s17, %s2657_s11 }
  0x2d   : > { %p2655_p6 = pneg %p2654_p5  ;;  %p2660_p10 = scmp.lt.s32.totalorder %s2658_s24, %s2651_s27 }
  0x2f   : > { %p2661_p13 = por %p2660_p10, %p2659_p7 }
  0x31   : > { %p2662_p12 = pnand %p2661_p13, %p2655_p6 }
  0x33   : > { %2665 = shalt.err (!%p2662_p12)
}
  0x34   : > { %s4266_s25 = smov 256   ;;  %s2896_s13 = smov 16  }
  0x35   : > { %2459 = dma.hbm_to_vmem [thread:$0]  (!%p3047_p0), %s435_s12, 1024, %s437_s17, %s3059_s14, %s4266_s25, %s4266_s25, %s2896_s13  }
  0x36   : > { %p3076_p4 = pnand %p2397_p1, %p467_p2  ;;  %s412_s27 = scalar_lea.hbm %s4243_s1, %s3043_s16 }
  0x37   : > { %s404_s24 = scalar_lea.vmem [#allocation2], %s3040_s15  ;;  %s458_s30 = scalar_lea.hbm %s4245_s3, %s3043_s16 }
  0x38   : > { %s413_s2 = sshll.u32 %s404_s24, 4  ;;  %s4325_s8 = sand.u32 1, %s2880_s19   ;;  %s414_s2 = int_to_ptr.vmem [resolvable:$true] %s413_s2 }
  0x39   : > { %s401_s0 = scalar_lea.sflag [#allocation3], %s4325_s8  ;;  %s2679_s17 = scalar_lea.vmem %s414_s2, 1024 }
  0x3a   : > { %p2680_p12 = scmp.ne.s32.totalorder %s414_s2, %s2679_s17  ;;  %s2897_s12 = smov [#allocation2]  }
  0x3b   : > { %s2684_s25 = sshll.u32 %s2897_s12, 4  ;;  %s2685_s25 = int_to_ptr.vmem [resolvable:$false] %s2684_s25 }
  0x3c   : > { %p2682_p1 = pnand %p2680_p12, %p2640_p3  ;;  %s2686_s21 = scalar_lea.vmem %s2685_s25, 2048 }
  0x3d   : > { %p2687_p5 = scmp.lt.s32.totalorder %s414_s2, %s2685_s25  ;;  %p2688_p6 = scmp.lt.s32.totalorder %s2686_s21, %s2679_s17 }
  0x3e   : > { %p2683_p2 = pneg %p2682_p1 }
  0x3f   : > { %p2689_p7 = por %p2688_p6, %p2687_p5 }
  0x41   : > { %p2690_p10 = pnand %p2689_p7, %p2683_p2 }
  0x43   : > { %2693 = shalt.err (!%p2690_p10)
}
  0x44   : > { %s4326_s9 = smov 256   ;;  %s450_s8 = scalar_lea.vmem [#allocation7], %s3040_s15 }
  0x45   : > { %2456 = dma.hbm_to_vmem [thread:$0]  (!%p3047_p0), %s412_s27, 1024, %s414_s2, %s401_s0, %s4326_s9, %s4326_s9, %s2896_s13  }
  0x46   : > { %s459_s10 = sshll.u32 %s450_s8, 4  ;;  %s2898_s25 = smov [#allocation7]   ;;  %s460_s10 = int_to_ptr.vmem [resolvable:$true] %s459_s10 }
  0x47   : > { %s2707_s26 = scalar_lea.vmem %s460_s10, 1024  ;;  %s2712_s24 = sshll.u32 %s2898_s25, 4  ;;  %s2713_s24 = int_to_ptr.vmem [resolvable:$false] %s2712_s24 }
  0x48   : > { %p2708_p13 = scmp.ne.s32.totalorder %s460_s10, %s2707_s26  ;;  %s2714_s17 = scalar_lea.vmem %s2713_s24, 2048 }
  0x49   : > { %p2715_p2 = scmp.lt.s32.totalorder %s460_s10, %s2713_s24  ;;  %p2716_p5 = scmp.lt.s32.totalorder %s2714_s17, %s2707_s26 }
  0x4a   : > { %p2710_p12 = pnand %p2708_p13, %p2640_p3 }
  0x4b   : > { %p2717_p6 = por %p2716_p5, %p2715_p2 }
  0x4c   : > { %p2711_p1 = pneg %p2710_p12 }
  0x4e   : > { %p2718_p7 = pnand %p2717_p6, %p2711_p1 }
  0x50   : > { %2721 = shalt.err (!%p2718_p7)
}
  0x51   : > { %2462 = dma.hbm_to_vmem [thread:$0]  (!%p3047_p0), %s458_s30, 1024, %s460_s10, %s3059_s14, %s4326_s9, %s4326_s9, %s2896_s13  }
  0x52   : > { %471 = sbr.rel (%p3076_p4) target bundleno = 829 (0x33d), region = 52 }
  0x57   : > { %s3117_s15 = sand.u32 1, %s2876_s18  }
  0x58   : > { %s3120_s28 = sshll.u32 %s3117_s15, 6  ;;  %s474_s27 = scalar_lea.sflag [#allocation3], %s3117_s15 }
  0x59   : > { %s3124_s12 = scalar_lea.vmem [#allocation2], %s3120_s28 }
  0x5a   : > { %2851 = dma.done.wait (%p3018_p8), %s474_s27, 1024  }
  0x5b   : > { %2853 = vsyncadd (%p3018_p8), %s474_s27, 4294966272  ;;  %s482_s30 = sand.u32 1, %s2998_s23   ;;  %s3134_s16 = scalar_lea.vmem [#allocation5], %s3120_s28 }
  0x5c   : > { %s483_s14 = scalar_lea.sflag [#allocation6], %s482_s30 }
  0x5d   : > { %2855 = dma.done.wait (%p3018_p8), %s483_s14, 2048  }
  0x5e   : > { %2857 = vsyncadd (%p3018_p8), %s483_s14, 4294965248  ;;  %v4268_v0 = vmov 0.0   ;;  %v2900_v1 = vmov 0   ;;  %s3143_s13 = scalar_lea.vmem [#allocation7], %s3120_s28  ;;  %v606_v10 = vld [vmem:[%s4247_s5 + $0x28] sm:$0xff]  ;;  %v608_v11 = vld [vmem:[%s4247_s5 + $0x38] sm:$0xff] }
  0x5f   : > { %738 = vmatprep.mubr.f32.mxu0 %v4268_v0  ;;  %2533 = vset.pattern.permute.xlu1 %v2900_v1  ;;  %v592_v2 = vld [vmem:[%s3143_s13 + $0x38] sm:$0xff]  ;;  %v591_v3 = vld [vmem:[%s3143_s13 + $0x30] sm:$0xff]  ;;  %v590_v4 = vld [vmem:[%s3143_s13 + $0x28] sm:$0xff]  ;;  %vm649_vm0 = vcmask 261120   ;;  %p569_p8 = scmp.lt.s32.totalorder %s2884_s20, 1  ;;  %s4370_s21 = sld [smem:[#allocation45_spill]] }
  0x60   : > { %2532 = vset.pattern.permute.xlu0 %v2900_v1  ;;  %1336 = vmatprep.mubr.f32.mxu1 %v4268_v0  ;;  %v589_v5 = vld [vmem:[%s3143_s13 + $0x20] sm:$0xff]  ;;  %v588_v6 = vld [vmem:[%s3143_s13 + $0x18] sm:$0xff]  ;;  %v587_v7 = vld [vmem:[%s3143_s13 + $0x10] sm:$0xff]  ;;  %s3808_s8 = scalar_lea.vmem [#allocation8], %s3120_s28  ;;  %s4380_s25 = sld [smem:[#allocation47_spill]] }
  0x61   : > { %698 = vmatprep.subr.mxu0 %v592_v2  ;;  %v586_v8 = vld [vmem:[%s3143_s13 + $0x8] sm:$0xff]  ;;  %v585_v9 = vld [vmem:[%s3143_s13] sm:$0xff]  ;;  %636 = vperm.xlu1 %2533, %v606_v10   ;;  %v607_v14 = vld [vmem:[%s4247_s5 + $0x30] sm:$0xff]  ;;  %s570_s27 = scalar_select %p569_p8, %s2884_s20, 1 }
  0x62   : > { %699 = vmatpush1.msra.mxu0 %v591_v3  ;;  %v593_v12 = vld [vmem:[%s4246_s4] sm:$0xff]  ;;  %646 = vperm.xlu0 %2532, %v608_v11   ;;  %v594_v15 = vld [vmem:[%s4246_s4 + $0x8] sm:$0xff]  ;;  %v603_v16 = vld [vmem:[%s4247_s5 + $0x10] sm:$0xff]  ;;  %s2074_s10 = sshll.u32 %s3808_s8, 4  ;;  %s2044_s0 = scalar_lea.sflag [#allocation4], %s3117_s15  ;;  %s3928_s10 = int_to_ptr.vmem [resolvable:$true] %s2074_s10 }
  0x63   : > { %700 = vmatprep.subr.mxu0 %v590_v4  ;;  %v605_v13 = vld [vmem:[%s4247_s5 + $0x20] sm:$0xff]  ;;  %v604_v17 = vld [vmem:[%s4247_s5 + $0x18] sm:$0xff]  ;;  %v595_v18 = vld [vmem:[%s4246_s4 + $0x10] sm:$0xff]  ;;  %s2434_s14 = sshll.u32 %s570_s27, 6  ;;  %s2722_s2 = scalar_lea.vmem %s3928_s10, 1024 }
  0x64   : > { %701 = vmatpush1.msra.mxu0 %v589_v5  ;;  %v601_v19 = vld [vmem:[%s4247_s5] sm:$0xff]  ;;  %v602_v20 = vld [vmem:[%s4247_s5 + $0x8] sm:$0xff]  ;;  %v596_v21 = vld [vmem:[%s4246_s4 + $0x18] sm:$0xff]  ;;  %p2723_p0 = scmp.ne.s32.totalorder %s3928_s10, %s2722_s2  ;;  %s2901_s27 = smov [#allocation8]  }
  0x65   : > { %702 = vmatprep.subr.mxu0 %v588_v6  ;;  %631 = vperm.xlu1 %2533, %v605_v13   ;;  %v1254_v22 = vld [vmem:[%s4249_s7 + $0x8] sm:$0xff]  ;;  %v1253_v23 = vld [vmem:[%s4249_s7] sm:$0xff]  ;;  %v599_v26 = vld [vmem:[%s4246_s4 + $0x30] sm:$0xff]  ;;  %s3704_s9 = scalar_lea.vmem %s4370_s21, %s2434_s14  ;;  %s2726_s14 = sshll.u32 %s2901_s27, 4  ;;  %s2727_s14 = int_to_ptr.vmem [resolvable:$false] %s2726_s14 }
  0x66   : > { %703 = vmatpush1.msra.mxu0 %v587_v7  ;;  %641 = vperm.xlu0 %2532, %v607_v14   ;;  %v597_v24 = vld [vmem:[%s4246_s4 + $0x20] sm:$0xff]  ;;  %v598_v25 = vld [vmem:[%s4246_s4 + $0x28] sm:$0xff]  ;;  %v600_v27 = vld [vmem:[%s4246_s4 + $0x38] sm:$0xff]  ;;  %p2724_p3 = pnand %p2723_p0, %p3022_p9  ;;  %s2728_s29 = scalar_lea.vmem %s2727_s14, 2048 }
  0x67   : > { %704 = vmatprep.subr.mxu0 %v586_v8  ;;  %p2729_p10 = scmp.lt.s32.totalorder %s3928_s10, %s2727_s14  ;;  %p2730_p13 = scmp.lt.s32.totalorder %s2728_s29, %s2722_s2 }
  0x68   : > { %705 = vmatpush1.msra.mxu0 %v585_v9  ;;  %p2725_p4 = pneg %p2724_p3 }
  0x69   : > { %2407 = vmatmul.mubr.msk.f32.vlgmr.msra.gmra.mxu0 %vm649_vm0, %v593_v12  ;;  %621 = vperm.xlu1 %2533, %v603_v16   ;;  %p2731_p12 = por %p2730_p13, %p2729_p10 }
  0x6a   : > { %744 = vmatprep.mubr.f32.mxu0 %v4268_v0  ;;  %626 = vperm.xlu0 %2532, %v604_v17  }
  0x6b   : > { %p2732_p1 = pnand %p2731_p12, %p2725_p4 }
  0x6d   : > { %2408 = vmatmul.mubr.msk.f32.gmra.mxu0 %vm649_vm0, %v594_v15  ;;  %611 = vperm.xlu1 %2533, %v601_v19  }
  0x6e   : > { %750 = vmatprep.mubr.f32.mxu0 %v4268_v0  ;;  %616 = vperm.xlu0 %2532, %v602_v20  }
  0x71   : > { %2409 = vmatmul.mubr.msk.f32.gmra.mxu0 %vm649_vm0, %v595_v18  ;;  %1262 = vperm.xlu1 %2533, %v1254_v22  }
  0x72   : > { %756 = vmatprep.mubr.f32.mxu0 %v4268_v0  ;;  %1257 = vperm.xlu0 %2532, %v1253_v23  }
  0x75   : > { %2410 = vmatmul.mubr.msk.f32.gmra.mxu0 %vm649_vm0, %v596_v21 }
  0x76   : > { %762 = vmatprep.mubr.f32.mxu0 %v4268_v0 }
  0x79   : > { %2411 = vmatmul.mubr.msk.f32.gmra.mxu0 %vm649_vm0, %v597_v24 }
  0x7a   : > { %768 = vmatprep.mubr.f32.mxu0 %v4268_v0 }
  0x7d   : > { %2412 = vmatmul.mubr.msk.f32.gmra.mxu0 %vm649_vm0, %v598_v25 }
  0x7e   : > { %774 = vmatprep.mubr.f32.mxu0 %v4268_v0 }
  0x81   : > { %2413 = vmatmul.mubr.msk.f32.gmra.mxu0 %vm649_vm0, %v599_v26 }
  0x82   : > { %780 = vmatprep.mubr.f32.mxu0 %v4268_v0 }
  0x85   : > { %2414 = vmatmul.mubr.msk.f32.gmra.mxu0 %vm649_vm0, %v600_v27 }
  0xdc   : > { %v3222_v28 = vpop.permute.xlu1 %636 }
  0xdd   : > { %v3224_v29 = vpop.permute.xlu0 %646 }
  0xe0   : > { %v3226_v30 = vpop.permute.xlu1 %631 }
  0xe1   : > { %v3228_v31 = vpop.permute.xlu0 %641 }
  0xe4   : > { %v622_v32 = vpop.permute.xlu1 %621 }
  0xe5   : > { %v627_v33 = vpop.permute.xlu0 %626 }
  0xe8   : > { %v612_v34 = vpop.permute.xlu1 %611 }
  0xe9   : > { %v617_v40 = vpop.permute.xlu0 %616 }
 0x129   : > { %v740_v35 = vpop.f32.mrf.mxu0 }
 0x12a   : > { %v3230_v36 = vadd.f32 %v740_v35, %v612_v34 }
 0x12b   : > { %v742_v37 = vpop.f32.mrf.mxu0 }
 0x12c   : > { %4327 = vst [vmem:[#allocation25_spill] sm:$0xff] %v3230_v36  ;;  %v3233_v38 = vmul.f32 0.70710677, %v3230_v36  ;;  %v3235_v39 = vadd.f32 %v742_v37, %v612_v34 }
 0x12d   : > { %v746_v41 = vpop.f32.mrf.mxu0 }
 0x12e   : > { %4328 = vst [vmem:[#allocation26_spill] sm:$0xff] %v3233_v38  ;;  %4329 = vst [vmem:[#allocation27_spill] sm:$0xff] %v3235_v39  ;;  %v819_v42 = vand.u32 2147483647, %v3233_v38  ;;  %v3239_v43 = vmul.f32 0.70710677, %v3235_v39  ;;  %v3241_v44 = vadd.f32 %v746_v41, %v617_v40 }
 0x12f   : > { %v748_v45 = vpop.f32.mrf.mxu0 }
 0x130   : > { %4330 = vst [vmem:[#allocation28_spill] sm:$0xff] %v3239_v43  ;;  %4331 = vst [vmem:[#allocation29_spill] sm:$0xff] %v3241_v44  ;;  %v835_v46 = vmul.f32 0.3275911, %v819_v42  ;;  %v820_v47 = vand.u32 2147483647, %v3239_v43  ;;  %v3247_v49 = vadd.f32 %v748_v45, %v617_v40 }
 0x131   : > { %v3245_v48 = vmul.f32 0.70710677, %v3241_v44  ;;  %v752_v50 = vpop.f32.mrf.mxu0  ;;  %v1075_v56 = vsub.f32 0.0, %v819_v42 }
 0x132   : > { %4333 = vst [vmem:[#allocation31_spill] sm:$0xff] %v3247_v49  ;;  %v3249_v51 = vadd.f32 1.0, %v835_v46  ;;  %v836_v52 = vmul.f32 0.3275911, %v820_v47  ;;  %v3253_v54 = vmul.f32 0.70710677, %v3247_v49  ;;  %v753_v61 = vadd.f32 %v752_v50, %v622_v32 }
 0x133   : > { %4332 = vst [vmem:[#allocation30_spill] sm:$0xff] %v3245_v48  ;;  %v821_v53 = vand.u32 2147483647, %v3245_v48  ;;  %v754_v55 = vpop.f32.mrf.mxu0  ;;  %v1076_v60 = vsub.f32 0.0, %v820_v47  ;;  %v1091_v7 = vmul.f32 %v1075_v56, %v819_v42 }
 0x134   : > { %4334 = vst [vmem:[#allocation32_spill] sm:$0xff] %v3253_v54  ;;  %v822_v58 = vand.u32 2147483647, %v3253_v54  ;;  %2534 = vrcp.f32 %v3249_v51  ;;  %v755_v62 = vadd.f32 %v754_v55, %v622_v32  ;;  %v3257_v63 = vadd.f32 1.0, %v836_v52 }
 0x135   : > { %v837_v57 = vmul.f32 0.3275911, %v821_v53  ;;  %v758_v59 = vpop.f32.mrf.mxu0  ;;  %v1077_v1 = vsub.f32 0.0, %v821_v53  ;;  %v3261_v5 = vmul.f32 0.70710677, %v753_v61  ;;  %v1092_v8 = vmul.f32 %v1076_v60, %v820_v47 }
 0x136   : > { %v838_v4 = vmul.f32 0.3275911, %v822_v58  ;;  %v3264_v10 = vmul.f32 0.70710677, %v755_v62  ;;  %2536 = vrcp.f32 %v3257_v63  ;;  %v1078_v12 = vsub.f32 0.0, %v822_v58 }
 0x137   : > { %v760_v2 = vpop.f32.mrf.mxu0  ;;  %v3259_v3 = vadd.f32 1.0, %v837_v57  ;;  %v823_v9 = vand.u32 2147483647, %v3261_v5  ;;  %v1093_v11 = vmul.f32 %v1077_v1, %v821_v53  ;;  %v3267_v13 = vadd.f32 %v758_v59, %v627_v33 }
 0x138   : > { %v3270_v14 = vadd.f32 1.0, %v838_v4  ;;  %v761_v16 = vadd.f32 %v760_v2, %v627_v33  ;;  %v824_v17 = vand.u32 2147483647, %v3264_v10  ;;  %v1107_v20 = vmul.f32 1.442695, %v1091_v7 }
 0x139   : > { %v764_v6 = vpop.f32.mrf.mxu0  ;;  %4335 = vst [vmem:[#allocation33_spill] sm:$0xff] %v3267_v13  ;;  %2538 = vrcp.f32 %v3259_v3  ;;  %v839_v15 = vmul.f32 0.3275911, %v823_v9  ;;  %v3274_v18 = vmul.f32 0.70710677, %v3267_v13  ;;  %v1094_v24 = vmul.f32 %v1078_v12, %v822_v58 }
 0x13a   : > { %v1109_v21 = vmul.f32 1.442695, %v1092_v8  ;;  %v1111_v23 = vmul.f32 1.442695, %v1093_v11  ;;  %v840_v25 = vmul.f32 0.3275911, %v824_v17  ;;  %2540 = vrcp.f32 %v3270_v14 }
 0x13b   : > { %v766_v19 = vpop.f32.mrf.mxu0  ;;  %v3276_v22 = vadd.f32 1.0, %v839_v15  ;;  %v825_v26 = vand.u32 2147483647, %v3274_v18  ;;  %v1079_v27 = vsub.f32 0.0, %v823_v9  ;;  %v3280_v32 = vmul.f32 0.70710677, %v761_v16 }
 0x13c   : > { %v765_v33 = vadd.f32 %v764_v6, %v3226_v30  ;;  %v3284_v34 = vadd.f32 1.0, %v840_v25  ;;  %v1080_v35 = vsub.f32 0.0, %v824_v17  ;;  %v1113_v45 = vmul.f32 1.442695, %v1094_v24 }
 0x13d   : > { %2542 = vrcp.f32 %v3276_v22  ;;  %v770_v37 = vpop.f32.mrf.mxu0  ;;  %v841_v40 = vmul.f32 0.3275911, %v825_v26  ;;  %v826_v41 = vand.u32 2147483647, %v3280_v32  ;;  %v1095_v46 = vmul.f32 %v1079_v27, %v823_v9 }
 0x13e   : > { %2544 = vpow2.f32 %v1107_v20  ;;  %v3287_v50 = vmul.f32 0.70710677, %v765_v33  ;;  %v1096_v52 = vmul.f32 %v1080_v35, %v824_v17  ;;  %v1081_v53 = vsub.f32 0.0, %v825_v26 }
 0x13f   : > { %2546 = vpow2.f32 %v1109_v21  ;;  %v842_v47 = vmul.f32 0.3275911, %v826_v41  ;;  %v772_v55 = vpop.f32.mrf.mxu0  ;;  %v3291_v57 = vadd.f32 1.0, %v841_v40  ;;  %v767_v59 = vadd.f32 %v766_v19, %v3226_v30 }
 0x140   : > { %2548 = vpow2.f32 %v1111_v23  ;;  %v3296_v60 = vmul.f32 0.5, %v753_v61  ;;  %v827_v1 = vand.u32 2147483647, %v3287_v50  ;;  %v1115_v4 = vmul.f32 1.442695, %v1095_v46 }
 0x141   : > { %v2535_v42 = vpop.eup %2534  ;;  %2550 = vrcp.f32 %v3284_v34  ;;  %v3293_v58 = vadd.f32 1.0, %v842_v47  ;;  %v3299_v6 = vmul.f32 0.5, %v755_v62  ;;  %v1082_v7 = vsub.f32 0.0, %v826_v41  ;;  %v776_v15 = vpop.f32.mrf.mxu0 }
 0x142   : > { %v883_v56 = vmul.f32 %v2535_v42, %v3249_v51  ;;  %2552 = vpow2.f32 %v1113_v45  ;;  %4336 = vst [vmem:[#allocation34_spill] sm:$0xff] %v3296_v60  ;;  %v1117_v51 = vmul.f32 1.442695, %v1096_v52  ;;  %v1097_v9 = vmul.f32 %v1081_v53, %v825_v26 }
 0x143   : > { %v2537_v2 = vpop.eup %2536  ;;  %4337 = vst [vmem:[#allocation35_spill] sm:$0xff] %v3299_v6  ;;  %2554 = vrcp.f32 %v3293_v58  ;;  %v3302_v11 = vmul.f32 0.5, %v761_v16  ;;  %v843_v12 = vmul.f32 0.3275911, %v827_v1  ;;  %v3305_v61 = vmul.f32 0.70710677, %v767_v59 }
 0x144   : > { %v899_v30 = vsub.f32 2.0, %v883_v56  ;;  %2556 = vrcp.f32 %v3291_v57  ;;  %v771_v17 = vadd.f32 %v770_v37, %v3222_v28  ;;  %v884_v62 = vmul.f32 %v2537_v2, %v3257_v63  ;;  %v778_v63 = vpop.f32.mrf.mxu0 }
 0x145   : > { %4338 = vst [vmem:[#allocation36_spill] sm:$0xff] %v3302_v11  ;;  %v3309_v19 = vadd.f32 1.0, %v843_v12  ;;  %v1083_v20 = vsub.f32 0.0, %v827_v1  ;;  %v773_v21 = vadd.f32 %v772_v55, %v3222_v28  ;;  %2558 = vpow2.f32 %v1115_v4 }
 0x146   : > { %v2539_v8 = vpop.eup %2538  ;;  %v1098_v16 = vmul.f32 %v1082_v7, %v826_v41  ;;  %v828_v24 = vand.u32 2147483647, %v3305_v61  ;;  %v1119_v26 = vmul.f32 1.442695, %v1097_v9  ;;  %v3314_v27 = vmul.f32 0.5, %v765_v33  ;;  %v782_v9 = vpop.f32.mrf.mxu0 }
 0x147   : > { %v885_v23 = vmul.f32 %v2539_v8, %v3259_v3  ;;  %v2541_v25 = vpop.eup %2540  ;;  %2560 = vrcp.f32 %v3309_v19  ;;  %v3317_v35 = vmul.f32 0.70710677, %v771_v17  ;;  %v3319_v40 = vmul.f32 %v2535_v42, %v899_v30 }
 0x148   : > { %4339 = vst [vmem:[#allocation37_spill] sm:$0xff] %v3314_v27  ;;  %2562 = vpow2.f32 %v1117_v51  ;;  %v844_v28 = vmul.f32 0.3275911, %v828_v24  ;;  %v1084_v45 = vsub.f32 0.0, %v828_v24  ;;  %v900_v41 = vsub.f32 2.0, %v884_v62 }
 0x149   : > { %v1099_v46 = vmul.f32 %v1083_v20, %v827_v1  ;;  %v829_v47 = vand.u32 2147483647, %v3317_v35  ;;  %v3324_v52 = vmul.f32 0.70710677, %v773_v21  ;;  %v901_v53 = vsub.f32 2.0, %v885_v23 }
 0x14a   : > { %v2543_v37 = vpop.eup %2542  ;;  %v886_v55 = vmul.f32 %v2541_v25, %v3270_v14  ;;  %v1121_v56 = vmul.f32 1.442695, %v1098_v16  ;;  %v3329_v4 = vadd.f32 1.0, %v844_v28  ;;  %2564 = vpow2.f32 %v1119_v26 }
 0x14b   : > { %v3321_v3 = vpop.eup %2544  ;;  %v887_v7 = vmul.f32 %v2543_v37, %v3276_v22  ;;  %v845_v51 = vmul.f32 0.3275911, %v829_v47  ;;  %v3335_v1 = vand.u32 2147483647, %v3324_v52  ;;  %v3337_v30 = vmul.f32 0.5, %v767_v59 }
 0x14c   : > { %4340 = vst [vmem:[#allocation38_spill] sm:$0xff] %v3321_v3  ;;  %v3326_v33 = vpop.eup %2546  ;;  %2566 = vrcp.f32 %v3329_v4  ;;  %v1100_v62 = vmul.f32 %v1084_v45, %v828_v24  ;;  %v777_v14 = vadd.f32 %v776_v15, %v3228_v31  ;;  %v1123_v20 = vmul.f32 1.442695, %v1099_v46  ;;  %v784_v45 = vpop.f32.mrf.mxu0 }
 0x14d   : > { %4341 = vst [vmem:[#allocation39_spill] sm:$0xff] %v3326_v33  ;;  %v3331_v42 = vpop.eup %2548  ;;  %4343 = vst [vmem:[#allocation41_spill] sm:$0xff] %v3337_v30  ;;  %v3341_v23 = vadd.f32 1.0, %v845_v51  ;;  %v1085_v16 = vsub.f32 0.0, %v829_v47  ;;  %v846_v22 = vmul.f32 0.3275911, %v3335_v1  ;;  %v3346_v28 = vmul.f32 %v2537_v2, %v900_v41 }
 0x14e   : > { %4342 = vst [vmem:[#allocation40_spill] sm:$0xff] %v3331_v42  ;;  %v2551_v12 = vpop.eup %2550  ;;  %v3348_v0 = vmul.f32 %v2539_v8, %v901_v53  ;;  %v902_v36 = vsub.f32 2.0, %v886_v55  ;;  %2568 = vpow2.f32 %v1121_v56  ;;  %v903_v39 = vsub.f32 2.0, %v887_v7 }
 0x14f   : > { %v3344_v26 = vpop.eup %2552  ;;  %v888_v24 = vmul.f32 %v2551_v12, %v3284_v34  ;;  %2570 = vrcp.f32 %v3341_v23  ;;  %v3352_v15 = vadd.f32 1.0, %v846_v22  ;;  %v1125_v46 = vmul.f32 1.442695, %v1100_v62 }
 0x150   : > { %4344 = vst [vmem:[#allocation42_spill] sm:$0xff] %v3344_v26  ;;  %v2555_v59 = vpop.eup %2554  ;;  %v3354_v51 = vmul.f32 0.5, %v771_v17  ;;  %v3356_v38 = vmul.f32 0.5, %v773_v21  ;;  %v3358_v2 = vmul.f32 0.70710677, %v777_v14  ;;  %2572 = vpow2.f32 %v1123_v20 }
 0x151   : > { %v2557_v8 = vpop.eup %2556  ;;  %v1101_v41 = vmul.f32 %v1085_v16, %v829_v47  ;;  %v3361_v53 = vadd.f32 %v778_v63, %v3228_v31  ;;  %v3364_v34 = vadd.f32 %v782_v9, %v3224_v29  ;;  %v3366_v55 = vmul.f32 %v2541_v25, %v902_v36 }
 0x152   : > { %4345 = vst [vmem:[#allocation43_spill] sm:$0xff] %v3356_v38  ;;  %v890_v56 = vmul.f32 %v2555_v59, %v3293_v58  ;;  %2574 = vrcp.f32 %v3352_v15  ;;  %v3371_v17 = vadd.f32 %v784_v45, %v3224_v29  ;;  %v3373_v21 = vpop.eup %2558  ;;  %v3375_v7 = vmul.f32 %v2543_v37, %v903_v39 }
 0x153   : > { %4346 = vst [vmem:[#allocation44_spill] sm:$0xff] %v3373_v21  ;;  %v904_v47 = vsub.f32 2.0, %v888_v24  ;;  %v831_v31 = vand.u32 2147483647, %v3358_v2  ;;  %v3379_v63 = vmul.f32 0.70710677, %v3361_v53  ;;  %v889_v36 = vmul.f32 %v2557_v8, %v3291_v57 }
 0x154   : > { %v2561_v9 = vpop.eup %2560  ;;  %2576 = vpow2.f32 %v1125_v46  ;;  %v1086_v58 = vsub.f32 0.0, %v3335_v1  ;;  %v3384_v25 = vmul.f32 0.70710677, %v3364_v34  ;;  %v1127_v37 = vmul.f32 1.442695, %v1101_v41 }
 0x155   : > { %v3386_v29 = vpop.eup %2562  ;;  %v891_v39 = vmul.f32 %v2561_v9, %v3309_v19  ;;  %v847_v62 = vmul.f32 0.3275911, %v831_v31  ;;  %v832_v20 = vand.u32 2147483647, %v3379_v63  ;;  %v906_v16 = vsub.f32 2.0, %v890_v56 }
 0x156   : > { %v3390_v22 = vmul.f32 0.5, %v777_v14  ;;  %v833_v24 = vand.u32 2147483647, %v3384_v25  ;;  %v3394_v57 = vmul.f32 0.70710677, %v3371_v17  ;;  %v1087_v43 = vsub.f32 0.0, %v831_v31 }
 0x157   : > { %v907_v45 = vsub.f32 2.0, %v891_v39  ;;  %v3396_v46 = vadd.f32 1.0, %v847_v62  ;;  %v848_v44 = vmul.f32 0.3275911, %v832_v20  ;;  %v3398_v49 = vpop.eup %2564  ;;  %v905_v19 = vsub.f32 2.0, %v889_v36 }
 0x158   : > { %v1088_v41 = vsub.f32 0.0, %v832_v20  ;;  %v849_v3 = vmul.f32 0.3275911, %v833_v24  ;;  %v834_v48 = vand.u32 2147483647, %v3394_v57  ;;  %v3401_v14 = vmul.f32 %v2551_v12, %v904_v47 }
 0x159   : > { %v2567_v56 = vpop.eup %2566  ;;  %v1102_v54 = vmul.f32 %v1086_v58, %v3335_v1  ;;  %2578 = vrcp.f32 %v3396_v46  ;;  %v3405_v33 = vadd.f32 1.0, %v848_v44  ;;  %v3407_v39 = vmul.f32 %v2561_v9, %v907_v45 }
 0x15a   : > { %v892_v62 = vmul.f32 %v2567_v56, %v3329_v4  ;;  %v3410_v42 = vadd.f32 1.0, %v849_v3  ;;  %v1089_v36 = vsub.f32 0.0, %v833_v24  ;;  %v3414_v60 = vmul.f32 %v2555_v59, %v906_v16 }
 0x15b   : > { %v3412_v26 = vpop.eup %2568  ;;  %2580 = vpow2.f32 %v1127_v37  ;;  %v1103_v12 = vmul.f32 %v1087_v43, %v831_v31  ;;  %v850_v47 = vmul.f32 0.3275911, %v834_v48  ;;  %v3416_v1 = vmul.f32 %v2557_v8, %v905_v19 }
 0x15c   : > { %v2571_v6 = vpop.eup %2570  ;;  %v908_v58 = vsub.f32 2.0, %v892_v62  ;;  %2582 = vrcp.f32 %v3405_v33  ;;  %v1104_v44 = vmul.f32 %v1088_v41, %v832_v20  ;;  %v1090_v4 = vsub.f32 0.0, %v834_v48 }
 0x15d   : > { %v893_v9 = vmul.f32 %v2571_v6, %v3341_v23  ;;  %2584 = vrcp.f32 %v3410_v42  ;;  %v3421_v3 = vadd.f32 1.0, %v850_v47  ;;  %v3423_v45 = vpop.eup %2572  ;;  %v1129_v43 = vmul.f32 1.442695, %v1102_v54 }
 0x15e   : > { %v3425_v59 = vmul.f32 %v2567_v56, %v908_v58  ;;  %v1105_v31 = vmul.f32 %v1089_v36, %v833_v24  ;;  %v939_v8 = vmul.f32 1.0614054, %v3407_v39  ;;  %v1131_v19 = vmul.f32 1.442695, %v1103_v12 }
 0x15f   : > { %v2575_v37 = vpop.eup %2574  ;;  %v909_v16 = vsub.f32 2.0, %v893_v9  ;;  %v3429_v20 = vmul.f32 0.5, %v3361_v53  ;;  %v938_v23 = vmul.f32 1.0614054, %v3414_v60  ;;  %2586 = vrcp.f32 %v3421_v3 }
 0x160   : > { %v894_v41 = vmul.f32 %v2575_v37, %v3352_v15  ;;  %v940_v62 = vmul.f32 1.0614054, %v3425_v59  ;;  %v955_v56 = vadd.f32 -1.4531521, %v939_v8  ;;  %v1133_v24 = vmul.f32 1.442695, %v1104_v44 }
 0x161   : > { %v3435_v47 = vpop.eup %2576  ;;  %v3437_v54 = vmul.f32 %v2571_v6, %v909_v16  ;;  %v1106_v36 = vmul.f32 %v1090_v4, %v834_v48  ;;  %v954_v58 = vadd.f32 -1.4531521, %v938_v23  ;;  %v1135_v9 = vmul.f32 1.442695, %v1105_v31 }
 0x162   : > { %v910_v12 = vsub.f32 2.0, %v894_v41  ;;  %v956_v53 = vadd.f32 -1.4531521, %v940_v62  ;;  %v971_v11 = vmul.f32 %v955_v56, %v3407_v39  ;;  %2588 = vpow2.f32 %v1129_v43 }
 0x163   : > { %v3441_v15 = vmul.f32 0.5, %v3364_v34  ;;  %v941_v27 = vmul.f32 1.0614054, %v3437_v54  ;;  %v937_v8 = vmul.f32 1.0614054, %v3416_v1  ;;  %2590 = vpow2.f32 %v1131_v19 }
 0x164   : > { %v3445_v13 = vmul.f32 %v2575_v37, %v910_v12  ;;  %v972_v6 = vmul.f32 %v956_v53, %v3425_v59  ;;  %v987_v48 = vadd.f32 1.4214138, %v971_v11  ;;  %2592 = vpow2.f32 %v1133_v24 }
 0x165   : > { %v1137_v44 = vmul.f32 1.442695, %v1106_v36  ;;  %v957_v4 = vadd.f32 -1.4531521, %v941_v27  ;;  %v970_v31 = vmul.f32 %v954_v58, %v3414_v60  ;;  %2594 = vpow2.f32 %v1135_v9 }
 0x166   : > { %v2579_v16 = vpop.eup %2578  ;;  %v942_v34 = vmul.f32 1.0614054, %v3445_v13  ;;  %v988_v43 = vadd.f32 1.4214138, %v972_v6  ;;  %v1003_v23 = vmul.f32 %v987_v48, %v3407_v39  ;;  %v953_v19 = vadd.f32 -1.4531521, %v937_v8 }
 0x167   : > { %v895_v41 = vmul.f32 %v2579_v16, %v3396_v46  ;;  %v973_v37 = vmul.f32 %v957_v4, %v3437_v54  ;;  %v936_v62 = vmul.f32 1.0614054, %v3401_v14  ;;  %v3458_v36 = vmul.f32 1.0614054, %v3375_v7 }
 0x168   : > { %v3454_v11 = vpop.eup %2580  ;;  %v958_v56 = vadd.f32 -1.4531521, %v942_v34  ;;  %v1004_v27 = vmul.f32 %v988_v43, %v3425_v59  ;;  %v1019_v24 = vadd.f32 -0.28449672, %v1003_v23  ;;  %2596 = vpow2.f32 %v1137_v44 }
 0x169   : > { %v2583_v58 = vpop.eup %2582  ;;  %v911_v12 = vsub.f32 2.0, %v895_v41  ;;  %v989_v9 = vadd.f32 1.4214138, %v973_v37  ;;  %v986_v53 = vadd.f32 1.4214138, %v970_v31  ;;  %vm1179_vm1 = vcmp.ge.f32.partialorder %v3287_v50, 0.0 }
 0x16a   : > { %v2585_v46 = vpop.eup %2584  ;;  %v896_v6 = vmul.f32 %v2583_v58, %v3405_v33  ;;  %v974_v8 = vmul.f32 %v958_v56, %v3445_v13  ;;  %v1020_v48 = vadd.f32 -0.28449672, %v1004_v27  ;;  %v1035_v4 = vmul.f32 %v1019_v24, %v3407_v39 }
 0x16b   : > { %v3463_v34 = vmul.f32 %v2579_v16, %v911_v12  ;;  %v897_v43 = vmul.f32 %v2585_v46, %v3410_v42  ;;  %v1005_v23 = vmul.f32 %v989_v9, %v3437_v54  ;;  %v952_v30 = vadd.f32 -1.4531521, %v936_v62 }
 0x16c   : > { %v912_v21 = vsub.f32 2.0, %v896_v6  ;;  %v990_v41 = vadd.f32 1.4214138, %v974_v8  ;;  %v1036_v44 = vmul.f32 %v1020_v48, %v3425_v59  ;;  %v1051_v31 = vadd.f32 0.2548296, %v1035_v4  ;;  %v2587_v37 = vpop.eup %2586 }
 0x16d   : > { %v913_v38 = vsub.f32 2.0, %v897_v43  ;;  %v943_v33 = vmul.f32 1.0614054, %v3463_v34  ;;  %v1021_v56 = vadd.f32 -0.28449672, %v1005_v23  ;;  %v1002_v27 = vmul.f32 %v986_v53, %v3414_v60 }
 0x16e   : > { %v3470_v24 = vmul.f32 %v2583_v58, %v912_v21  ;;  %v898_v16 = vmul.f32 %v2587_v37, %v3421_v3  ;;  %v1006_v42 = vmul.f32 %v990_v41, %v3445_v13  ;;  %v1052_v12 = vadd.f32 0.2548296, %v1036_v44 }
 0x16f   : > { %v3474_v62 = vmul.f32 %v2585_v46, %v913_v38  ;;  %v959_v9 = vadd.f32 -1.4531521, %v943_v33  ;;  %v1037_v6 = vmul.f32 %v1021_v56, %v3437_v54  ;;  %v1067_v8 = vmul.f32 %v1051_v31, %v3407_v39  ;;  %v2589_v48 = vpop.eup %2588 }
 0x170   : > { %v914_v4 = vsub.f32 2.0, %v898_v16  ;;  %v944_v43 = vmul.f32 1.0614054, %v3470_v24  ;;  %v1022_v23 = vadd.f32 -0.28449672, %v1006_v42  ;;  %v1068_v21 = vmul.f32 %v1052_v12, %v3425_v59  ;;  %v3480_v58 = vpop.eup %2590 }
 0x171   : > { %v945_v3 = vmul.f32 1.0614054, %v3474_v62  ;;  %v975_v53 = vmul.f32 %v959_v9, %v3463_v34  ;;  %v1053_v38 = vadd.f32 0.2548296, %v1037_v6  ;;  %v1147_v46 = vmul.f32 %v3423_v45, %v1067_v8  ;;  %v3485_v41 = vpop.eup %2592 }
 0x172   : > { %v3487_v44 = vmul.f32 %v2587_v37, %v914_v4  ;;  %v960_v39 = vadd.f32 -1.4531521, %v944_v43  ;;  %v1038_v31 = vmul.f32 %v1022_v23, %v3445_v13  ;;  %v1148_v33 = vmul.f32 %v3435_v47, %v1068_v21  ;;  %v3491_v56 = vpop.eup %2594 }
 0x173   : > { %v961_v59 = vadd.f32 -1.4531521, %v945_v3  ;;  %v991_v16 = vadd.f32 1.4214138, %v975_v53  ;;  %v1069_v42 = vmul.f32 %v1053_v38, %v3437_v54  ;;  %v969_v12 = vmul.f32 %v953_v19, %v3416_v1 }
 0x174   : > { %v946_v9 = vmul.f32 1.0614054, %v3487_v44  ;;  %v976_v45 = vmul.f32 %v960_v39, %v3470_v24  ;;  %v1054_v6 = vadd.f32 0.2548296, %v1038_v31  ;;  %v968_v37 = vmul.f32 %v952_v30, %v3401_v14 }
 0x175   : > { %vm1180_vm2 = vcmp.ge.f32.partialorder %v3305_v61, 0.0  ;;  %v977_v47 = vmul.f32 %v961_v59, %v3474_v62  ;;  %v1007_v8 = vmul.f32 %v991_v16, %v3463_v34  ;;  %v1163_v4 = vsub.f32 1.0, %v1147_v46  ;;  %v3502_v54 = vpop.eup %2596 }
 0x176   : > { %v1018_v43 = vadd.f32 -0.28449672, %v1002_v27  ;;  %v962_v19 = vadd.f32 -1.4531521, %v946_v9  ;;  %v992_v23 = vadd.f32 1.4214138, %v976_v45  ;;  %v1070_v21 = vmul.f32 %v1054_v6, %v3445_v13 }
 0x177   : > { %v1164_v3 = vsub.f32 1.0, %v1148_v33  ;;  %v993_v53 = vadd.f32 1.4214138, %v977_v47  ;;  %v1023_v38 = vadd.f32 -0.28449672, %v1007_v8  ;;  %v3506_v30 = vmul.f32 %v3454_v11, %v1069_v42 }
 0x178   : > { %v951_v39 = vadd.f32 -1.4531521, %v3458_v36  ;;  %v978_v31 = vmul.f32 %v962_v19, %v3487_v44  ;;  %v1008_v59 = vmul.f32 %v992_v23, %v3470_v24  ;;  %v985_v46 = vadd.f32 1.4214138, %v969_v12 }
 0x179   : > { %v984_v27 = vadd.f32 1.4214138, %v968_v37  ;;  %v1009_v16 = vmul.f32 %v993_v53, %v3474_v62  ;;  %v1039_v9 = vmul.f32 %v1023_v38, %v3463_v34  ;;  %v1150_v45 = vmul.f32 %v2589_v48, %v1070_v21 }
 0x17a   : > { %v1034_v13 = vmul.f32 %v1018_v43, %v3414_v60  ;;  %v994_v33 = vadd.f32 1.4214138, %v978_v31  ;;  %v1024_v6 = vadd.f32 -0.28449672, %v1008_v59  ;;  %v1196_v47 = vsub.f32 0.0, %v1164_v3 }
 0x17b   : > { %v1195_v11 = vsub.f32 0.0, %v1163_v4  ;;  %v3515_v42 = vmul.f32 0.5, %v3371_v17  ;;  %v1025_v36 = vadd.f32 -0.28449672, %v1009_v16  ;;  %v1055_v8 = vadd.f32 0.2548296, %v1039_v9 }
 0x17c   : > { %v1165_v19 = vsub.f32 1.0, %v3506_v30  ;;  %vm1181_vm3 = vcmp.ge.f32.partialorder %v3317_v35, 0.0  ;;  %vm1182_vm4 = vcmp.ge.f32.partialorder %v3324_v52, 0.0  ;;  %v1010_v12 = vmul.f32 %v994_v33, %v3487_v44 }
 0x17d   : > { %v1040_v48 = vmul.f32 %v1024_v6, %v3470_v24  ;;  %v1001_v37 = vmul.f32 %v985_v46, %v3416_v1  ;;  %v1000_v43 = vmul.f32 %v984_v27, %v3401_v14  ;;  %v1041_v23 = vmul.f32 %v1025_v36, %v3474_v62 }
 0x17e   : > { %v1071_v17 = vmul.f32 %v1055_v8, %v3463_v34  ;;  %v1166_v21 = vsub.f32 1.0, %v1150_v45  ;;  %v1050_v53 = vadd.f32 0.2548296, %v1034_v13  ;;  %vm1183_vm5 = vcmp.ge.f32.partialorder %v3358_v2, 0.0 }
 0x17f   : > { %v1026_v38 = vadd.f32 -0.28449672, %v1010_v12  ;;  %v1056_v30 = vadd.f32 0.2548296, %v1040_v48  ;;  %v1212_v31 = vsel %vm1180_vm2, %v1164_v3, %v1196_v47  ;;  %v1211_v59 = vsel %vm1179_vm1, %v1163_v4, %v1195_v11 }
 0x180   : > { %vm1184_vm6 = vcmp.ge.f32.partialorder %v3379_v63, 0.0  ;;  %v1057_v46 = vadd.f32 0.2548296, %v1041_v23  ;;  %v1151_v27 = vmul.f32 %v3480_v58, %v1071_v17  ;;  %v1197_v16 = vsub.f32 0.0, %v1165_v19 }
 0x181   : > { %v1066_v34 = vmul.f32 %v1050_v53, %v3414_v60  ;;  %vm1185_vm7 = vcmp.ge.f32.partialorder %v3384_v25, 0.0  ;;  %v1042_v9 = vmul.f32 %v1026_v38, %v3487_v44  ;;  %v1072_v45 = vmul.f32 %v1056_v30, %v3470_v24 }
 0x182   : > { %v1017_v13 = vadd.f32 -0.28449672, %v1001_v37  ;;  %v1016_v61 = vadd.f32 -0.28449672, %v1000_v43  ;;  %v1073_v3 = vmul.f32 %v1057_v46, %v3474_v62  ;;  %v1167_v50 = vsub.f32 1.0, %v1151_v27 }
 0x183   : > { %v1198_v4 = vsub.f32 0.0, %v1166_v21  ;;  %v1146_v33 = vmul.f32 %v3412_v26, %v1066_v34  ;;  %v1058_v6 = vadd.f32 0.2548296, %v1042_v9  ;;  %v1152_v58 = vmul.f32 %v3485_v41, %v1072_v45 }
 0x184   : > { %v1033_v47 = vmul.f32 %v1017_v13, %v3416_v1  ;;  %v1032_v60 = vmul.f32 %v1016_v61, %v3401_v14  ;;  %vm1186_vm8 = vcmp.ge.f32.partialorder %v3394_v57, 0.0  ;;  %v1153_v11 = vmul.f32 %v3491_v56, %v1073_v3 }
 0x185   : > { %v1199_v24 = vsub.f32 0.0, %v1167_v50  ;;  %v3544_v36 = vadd.f32 1.0, %v1212_v31  ;;  %v967_v62 = vmul.f32 %v951_v39, %v3375_v7  ;;  %v1074_v8 = vmul.f32 %v1058_v6, %v3487_v44 }
 0x186   : > { %v1168_v12 = vsub.f32 1.0, %v1152_v58  ;;  %v1049_v26 = vadd.f32 0.2548296, %v1033_v47  ;;  %v1048_v48 = vadd.f32 0.2548296, %v1032_v60  ;;  %v1169_v37 = vsub.f32 1.0, %v1153_v11 }
 0x187   : > { %v1214_v41 = vsel %vm1182_vm4, %v1166_v21, %v1198_v4  ;;  %v1213_v43 = vsel %vm1181_vm3, %v1165_v19, %v1197_v16  ;;  %v983_v23 = vadd.f32 1.4214138, %v967_v62  ;;  %vm1178_vm9 = vcmp.ge.f32.partialorder %v3280_v32, 0.0 }
 0x188   : > { %v1154_v56 = vmul.f32 %v3502_v54, %v1074_v8  ;;  %v1200_v17 = vsub.f32 0.0, %v1168_v12  ;;  %v1162_v53 = vsub.f32 1.0, %v1146_v33  ;;  %v1065_v39 = vmul.f32 %v1049_v26, %v3416_v1 }
 0x189   : > { %vm1177_vm10 = vcmp.ge.f32.partialorder %v3274_v18, 0.0  ;;  %v1201_v44 = vsub.f32 0.0, %v1169_v37  ;;  %v1215_v38 = vsel %vm1183_vm5, %v1167_v50, %v1199_v24  ;;  %v1064_v52 = vmul.f32 %v1048_v48, %v3401_v14 }
 0x18a   : > { %v999_v35 = vmul.f32 %v983_v23, %v3375_v7  ;;  %vm1176_vm11 = vcmp.ge.f32.partialorder %v3264_v10, 0.0  ;;  %v1170_v19 = vsub.f32 1.0, %v1154_v56  ;;  %v1216_v54 = vsel %vm1184_vm6, %v1168_v12, %v1200_v17 }
 0x18b   : > { %v1229_v21 = vadd.f32 1.0, %v1213_v43  ;;  %v1227_v30 = vadd.f32 1.0, %v1211_v59  ;;  %v1217_v1 = vsel %vm1185_vm7, %v1169_v37, %v1201_v44  ;;  %v1230_v31 = vadd.f32 1.0, %v1214_v41  ;;  %v4347_v37 = vld [vmem:[#allocation43_spill] sm:$0xff]  ;;  %v4348_v41 = vld [vmem:[#allocation44_spill] sm:$0xff] }
 0x18c   : > { %v1145_v46 = vmul.f32 %v3398_v49, %v1065_v39  ;;  %v1144_v2 = vmul.f32 %v3386_v29, %v1064_v52  ;;  %v1202_v27 = vsub.f32 0.0, %v1170_v19  ;;  %v1231_v14 = vadd.f32 1.0, %v1215_v38 }
 0x18d   : > { %v1194_v16 = vsub.f32 0.0, %v1162_v53  ;;  %v1015_v34 = vadd.f32 -0.28449672, %v999_v35  ;;  %v1232_v9 = vadd.f32 1.0, %v1216_v54  ;;  %v934_v63 = vmul.f32 1.0614054, %v3366_v55 }
 0x18e   : > { %v1161_v45 = vsub.f32 1.0, %v1145_v46  ;;  %v1160_v13 = vsub.f32 1.0, %v1144_v2  ;;  %v1218_v59 = vsel %vm1186_vm8, %v1170_v19, %v1202_v27  ;;  %v1233_v61 = vadd.f32 1.0, %v1217_v1  ;;  %v4350_v54 = vld [vmem:[#allocation33_spill] sm:$0xff]  ;;  %v4352_v27 = vld [vmem:[#allocation36_spill] sm:$0xff] }
 0x18f   : > { %v1031_v25 = vmul.f32 %v1015_v34, %v3375_v7  ;;  %v933_v3 = vmul.f32 1.0614054, %v3348_v0  ;;  %v1234_v49 = vadd.f32 1.0, %v1218_v59  ;;  %v950_v4 = vadd.f32 -1.4531521, %v934_v63  ;;  %v4351_v1 = vld [vmem:[#allocation37_spill] sm:$0xff] }
 0x190   : > { %v1193_v50 = vsub.f32 0.0, %v1161_v45  ;;  %v1192_v29 = vsub.f32 0.0, %v1160_v13  ;;  %v1245_v33 = vmul.f32 %v1229_v21, %v3354_v51  ;;  %v932_v47 = vmul.f32 1.0614054, %v3346_v28 }
 0x191   : > { %v1047_v6 = vadd.f32 0.2548296, %v1031_v25  ;;  %v949_v58 = vadd.f32 -1.4531521, %v933_v3  ;;  %vm1175_vm12 = vcmp.ge.f32.partialorder %v3261_v5, 0.0  ;;  %v1250_v57 = vmul.f32 %v1234_v49, %v3515_v42 }
 0x192   : > { %v1248_v60 = vmul.f32 %v1232_v9, %v3429_v20  ;;  %v1210_v11 = vsel %vm1178_vm9, %v1162_v53, %v1194_v16  ;;  %v966_v24 = vmul.f32 %v950_v4, %v3366_v55  ;;  %v1249_v62 = vmul.f32 %v1233_v61, %v3441_v15 }
 0x193   : > { %v1209_v51 = vsel %vm1177_vm10, %v1161_v45, %v1193_v50  ;;  %v1063_v8 = vmul.f32 %v1047_v6, %v3375_v7  ;;  %v965_v12 = vmul.f32 %v949_v58, %v3348_v0  ;;  %1288 = vmatprep.subr.mxu1 %v1250_v57  ;;  %v1208_v42 = vsel %vm1176_vm11, %v1160_v13, %v1192_v29  ;;  %v4353_v45 = vld [vmem:[#allocation35_spill] sm:$0xff]  ;;  %v4354_v50 = vld [vmem:[#allocation34_spill] sm:$0xff] }
 0x194   : > { %v982_v26 = vadd.f32 1.4214138, %v966_v24  ;;  %v948_v20 = vadd.f32 -1.4531521, %v932_v47  ;;  %v931_v32 = vmul.f32 1.0614054, %v3319_v40  ;;  %1289 = vmatpush1.msra.mxu1 %v1249_v62  ;;  %v1247_v48 = vmul.f32 %v1231_v14, %v3390_v22 }
 0x195   : > { %v1246_v15 = vmul.f32 %v1230_v31, %v4347_v37  ;;  %v1143_v18 = vmul.f32 %v4348_v41, %v1063_v8  ;;  %v981_v43 = vadd.f32 1.4214138, %v965_v12  ;;  %1290 = vmatprep.subr.mxu1 %v1248_v60  ;;  %v1226_v7 = vadd.f32 1.0, %v1210_v11  ;;  %v4349_v22 = vld [vmem:[#allocation41_spill] sm:$0xff]  ;;  %v4355_v58 = vld [vmem:[#allocation42_spill] sm:$0xff]  ;;  %v4356_v11 = vld [vmem:[#allocation40_spill] sm:$0xff] }
 0x196   : > { %v998_v23 = vmul.f32 %v982_v26, %v3366_v55  ;;  %v964_v56 = vmul.f32 %v948_v20, %v3346_v28  ;;  %v947_v10 = vadd.f32 -1.4531521, %v931_v32  ;;  %1291 = vmatpush1.msra.mxu1 %v1247_v48  ;;  %v1225_v17 = vadd.f32 1.0, %v1209_v51  ;;  %v4358_v32 = vld [vmem:[#allocation32_spill] sm:$0xff]  ;;  %v4359_v48 = vld [vmem:[#allocation30_spill] sm:$0xff] }
 0x197   : > { %v1224_v53 = vadd.f32 1.0, %v1208_v42  ;;  %v1159_v39 = vsub.f32 1.0, %v1143_v18  ;;  %v997_v44 = vmul.f32 %v981_v43, %v3348_v0  ;;  %1292 = vmatprep.subr.mxu1 %v1246_v15  ;;  %v1244_v38 = vmul.f32 %v3544_v36, %v4349_v22  ;;  %v4360_v41 = vld [vmem:[#allocation38_spill] sm:$0xff]  ;;  %v4361_v43 = vld [vmem:[#allocation31_spill] sm:$0xff] }
 0x198   : > { %v1014_v52 = vadd.f32 -0.28449672, %v998_v23  ;;  %v980_v35 = vadd.f32 1.4214138, %v964_v56  ;;  %v963_v19 = vmul.f32 %v947_v10, %v3319_v40  ;;  %v793_v21 = vmul.f32 0.5, %v4350_v54  ;;  %1293 = vmatpush1.msra.mxu1 %v1245_v33  ;;  %v4362_v56 = vld [vmem:[#allocation29_spill] sm:$0xff] }
 0x199   : > { %v1243_v31 = vmul.f32 %v1227_v30, %v4351_v1  ;;  %v1191_v46 = vsub.f32 0.0, %v1159_v39  ;;  %v1013_v2 = vadd.f32 -0.28449672, %v997_v44  ;;  %1294 = vmatprep.subr.mxu1 %v1244_v38  ;;  %v1242_v14 = vmul.f32 %v1226_v7, %v4352_v27  ;;  %v4363_v44 = vld [vmem:[#allocation28_spill] sm:$0xff] }
 0x19a   : > { %v1030_v16 = vmul.f32 %v1014_v52, %v3366_v55  ;;  %v996_v34 = vmul.f32 %v980_v35, %v3346_v28  ;;  %v979_v9 = vadd.f32 1.4214138, %v963_v19  ;;  %v1241_v36 = vmul.f32 %v1225_v17, %v793_v21  ;;  %v4364_v35 = vld [vmem:[#allocation26_spill] sm:$0xff]  ;;  %v4365_v19 = vld [vmem:[#allocation27_spill] sm:$0xff] }
 0x19b   : > { %1295 = vmatpush1.msra.mxu1 %v1243_v31  ;;  %v1240_v13 = vmul.f32 %v1224_v53, %v4353_v45  ;;  %v1207_v63 = vsel %vm1175_vm12, %v1159_v39, %v1191_v46  ;;  %v1029_v59 = vmul.f32 %v1013_v2, %v3348_v0  ;;  %vm1174_vm13 = vcmp.ge.f32.partialorder %v4358_v32, 0.0  ;;  %v4366_v31 = vld [vmem:[#allocation25_spill] sm:$0xff] }
 0x19c   : > { %1296 = vmatprep.subr.mxu1 %v1242_v14  ;;  %v1223_v30 = vadd.f32 1.0, %v1207_v63  ;;  %v1046_v61 = vadd.f32 0.2548296, %v1030_v16  ;;  %v1012_v25 = vadd.f32 -0.28449672, %v996_v34  ;;  %v995_v3 = vmul.f32 %v979_v9, %v3319_v40  ;;  %v1251_v16 = vld [vmem:[%s4248_s6] sm:$0xff] }
 0x19d   : > { %1297 = vmatpush1.msra.mxu1 %v1241_v36  ;;  %v1045_v49 = vadd.f32 0.2548296, %v1029_v59  ;;  %vm1173_vm14 = vcmp.ge.f32.partialorder %v4359_v48, 0.0  ;;  %v790_v7 = vmul.f32 0.5, %v4361_v43  ;;  %v789_v10 = vmul.f32 0.5, %v4362_v56  ;;  %v1252_v9 = vld [vmem:[%s4248_s6 + $0x8] sm:$0xff]  ;;  %v1258_v36 = vpop.permute.xlu0 %1257 }
 0x19e   : > { %1298 = vmatprep.subr.mxu1 %v1240_v13  ;;  %v1239_v29 = vmul.f32 %v1223_v30, %v4354_v50  ;;  %v1062_v4 = vmul.f32 %v1046_v61, %v3366_v55  ;;  %v1028_v33 = vmul.f32 %v1012_v25, %v3346_v28  ;;  %v1011_v6 = vadd.f32 -0.28449672, %v995_v3  ;;  %v4357_v55 = vld [vmem:[#allocation39_spill] sm:$0xff]  ;;  %v1263_v25 = vpop.permute.xlu1 %1262 }
 0x19f   : > { %v1061_v5 = vmul.f32 %v1045_v49, %v3348_v0  ;;  %vm1172_vm15 = vcmp.ge.f32.partialorder %v4363_v44, 0.0  ;;  %vm1171_vm0 = vcmp.ge.f32.partialorder %v4364_v35, 0.0  ;;  %v788_v54 = vmul.f32 0.5, %v4365_v19 }
 0x1a0   : > { %1299 = vmatpush1.msra.mxu1 %v1239_v29  ;;  %v1142_v47 = vmul.f32 %v4355_v58, %v1062_v4  ;;  %v1044_v57 = vadd.f32 0.2548296, %v1028_v33  ;;  %v1027_v60 = vmul.f32 %v1011_v6, %v3319_v40  ;;  %v787_v46 = vmul.f32 0.5, %v4366_v31 }
 0x1a1   : > { %v1141_v24 = vmul.f32 %v4356_v11, %v1061_v5  ;;  %vm1265_vm1 = vcmask 523264   ;;  %v4367_v34 = vmov 0.0   ;;  %vm1349_vm2 = vcmask 1043456  }
 0x1a2   : > { %v1158_v62 = vsub.f32 1.0, %v1142_v47  ;;  %v1060_v51 = vmul.f32 %v1044_v57, %v3346_v28  ;;  %v1043_v8 = vadd.f32 0.2548296, %v1027_v60  ;;  %vm1394_vm3 = vcmask 1047556  }
 0x1a3   : > { %v1157_v12 = vsub.f32 1.0, %v1141_v24 }
 0x1a4   : > { %v1190_v42 = vsub.f32 0.0, %v1158_v62  ;;  %v1140_v26 = vmul.f32 %v4357_v55, %v1060_v51  ;;  %v1059_v20 = vmul.f32 %v1043_v8, %v3319_v40 }
 0x1a5   : > { %v1189_v0 = vsub.f32 0.0, %v1157_v12 }
 0x1a6   : > { %v1206_v37 = vsel %vm1174_vm13, %v1158_v62, %v1190_v42  ;;  %v1156_v15 = vsub.f32 1.0, %v1140_v26  ;;  %v1139_v18 = vmul.f32 %v4360_v41, %v1059_v20 }
 0x1a7   : > { %v1222_v23 = vadd.f32 1.0, %v1206_v37  ;;  %v1205_v28 = vsel %vm1173_vm14, %v1157_v12, %v1189_v0 }
 0x1a8   : > { %v1221_v17 = vadd.f32 1.0, %v1205_v28  ;;  %v1188_v53 = vsub.f32 0.0, %v1156_v15  ;;  %v1155_v39 = vsub.f32 1.0, %v1139_v18 }
 0x1a9   : > { %v1238_v40 = vmul.f32 %v1222_v23, %v790_v7 }
 0x1aa   : > { %v1237_v22 = vmul.f32 %v1221_v17, %v789_v10  ;;  %v1204_v38 = vsel %vm1172_vm15, %v1156_v15, %v1188_v53  ;;  %v1187_v52 = vsub.f32 0.0, %v1155_v39 }
 0x1ab   : > { %1300 = vmatprep.subr.mxu1 %v1238_v40  ;;  %v1220_v21 = vadd.f32 1.0, %v1204_v38 }
 0x1ac   : > { %1301 = vmatpush1.msra.mxu1 %v1237_v22  ;;  %v1203_v1 = vsel %vm1171_vm0, %v1155_v39, %v1187_v52 }
 0x1ad   : > { %v1236_v2 = vmul.f32 %v1220_v21, %v788_v54  ;;  %v1219_v27 = vadd.f32 1.0, %v1203_v1 }
 0x1af   : > { %1302 = vmatprep.subr.mxu1 %v1236_v2  ;;  %v1235_v14 = vmul.f32 %v1219_v27, %v787_v46 }
 0x1b1   : > { %1303 = vmatpush1.msra.mxu1 %v1235_v14 }
 0x1b2   : > { %2415 = vmatmul.mubr.msk.f32.vlgmr.msra.gmra.mxu1 %vm1265_vm1, %v1251_v16 }
 0x1b3   : > { %1342 = vmatprep.mubr.f32.mxu1 %v4367_v34 }
 0x1b6   : > { %2416 = vmatmul.mubr.msk.f32.gmra.mxu1 %vm1265_vm1, %v1252_v9 }
 0x272   : > { %v1338_v45 = vpop.f32.mrf.mxu1 }
 0x273   : > { %v1339_v13 = vadd.f32 %v1338_v45, %v1258_v36 }
 0x274   : > { %v1340_v63 = vpop.f32.mrf.mxu1 }
 0x275   : > { %v1350_v59 = vsel %vm1349_vm2, %v1339_v13, -inf  ;;  %v1395_v30 = vsel %vm1394_vm3, %v1339_v13, -inf  ;;  %v3635_v61 = vadd.f32 %v1340_v63, %v1258_v36 }
 0x276   : > { %v1351_v3 = vrot.slane %v1350_v59, 4  ;;  %v1396_v49 = vrot.slane %v1395_v30, 4  ;;  %v1344_v50 = vpop.f32.mrf.mxu1 }
 0x277   : > { %v1357_v29 = vsel %vm1349_vm2, %v3635_v61, -inf  ;;  %v1402_v4 = vsel %vm1394_vm3, %v3635_v61, -inf  ;;  %v3641_v33 = vadd.f32 %v1344_v50, %v1263_v25 }
 0x278   : > { %v1352_v6 = vmax.f32 %v1350_v59, %v1351_v3  ;;  %v1397_v5 = vmax.f32 %v1395_v30, %v1396_v49  ;;  %v1358_v58 = vrot.slane %v1357_v29, 4  ;;  %v1403_v47 = vrot.slane %v1402_v4, 4  ;;  %v1346_v57 = vpop.f32.mrf.mxu1 }
 0x279   : > { %v1445_v60 = vsel %vm1349_vm2, %v3641_v33, -inf  ;;  %v1489_v11 = vsel %vm1394_vm3, %v3641_v33, -inf  ;;  %v3647_v24 = vadd.f32 %v1346_v57, %v1263_v25 }
 0x27a   : > { %v1353_v62 = vrot.slane %v1352_v6, 2  ;;  %v1398_v51 = vrot.slane %v1397_v5, 2  ;;  %v1359_v8 = vmax.f32 %v1357_v29, %v1358_v58  ;;  %v1404_v12 = vmax.f32 %v1402_v4, %v1403_v47 }
 0x27b   : > { %v1446_v42 = vrot.slane %v1445_v60, 4  ;;  %v1490_v55 = vrot.slane %v1489_v11, 4  ;;  %v1452_v26 = vsel %vm1349_vm2, %v3647_v24, -inf  ;;  %v1496_v20 = vsel %vm1394_vm3, %v3647_v24, -inf }
 0x27c   : > { %v1354_v32 = vmax.f32 %v1352_v6, %v1353_v62  ;;  %v1399_v0 = vmax.f32 %v1397_v5, %v1398_v51  ;;  %v1360_v48 = vrot.slane %v1359_v8, 2  ;;  %v1405_v37 = vrot.slane %v1404_v12, 2 }
 0x27d   : > { %v1447_v15 = vmax.f32 %v1445_v60, %v1446_v42  ;;  %v1491_v41 = vmax.f32 %v1489_v11, %v1490_v55  ;;  %v1453_v18 = vrot.slane %v1452_v26, 4  ;;  %v1497_v43 = vrot.slane %v1496_v20, 4 }
 0x27e   : > { %v1355_v7 = vrot.slane %v1354_v32, 1  ;;  %v1400_v23 = vrot.slane %v1399_v0, 1  ;;  %v1361_v28 = vmax.f32 %v1359_v8, %v1360_v48  ;;  %v1406_v56 = vmax.f32 %v1404_v12, %v1405_v37 }
 0x27f   : > { %v1448_v10 = vrot.slane %v1447_v15, 2  ;;  %v1492_v17 = vrot.slane %v1491_v41, 2  ;;  %v1454_v53 = vmax.f32 %v1452_v26, %v1453_v18  ;;  %v1498_v39 = vmax.f32 %v1496_v20, %v1497_v43 }
 0x280   : > { %v1356_v44 = vmax.f32 %v1354_v32, %v1355_v7  ;;  %v1401_v40 = vmax.f32 %v1399_v0, %v1400_v23  ;;  %v1362_v22 = vrot.slane %v1361_v28, 1  ;;  %v1407_v38 = vrot.slane %v1406_v56, 1 }
 0x281   : > { %v1449_v52 = vmax.f32 %v1447_v15, %v1448_v10  ;;  %v1493_v35 = vmax.f32 %v1491_v41, %v1492_v17  ;;  %v1455_v19 = vrot.slane %v1454_v53, 2  ;;  %v1499_v54 = vrot.slane %v1498_v39, 2 }
 0x282   : > { %v1364_v21 = vsub.f32 %v1339_v13, %v1356_v44  ;;  %v1409_v1 = vsub.f32 %v1339_v13, %v1401_v40  ;;  %v1363_v31 = vmax.f32 %v1361_v28, %v1362_v22  ;;  %v1408_v46 = vmax.f32 %v1406_v56, %v1407_v38 }
 0x283   : > { %v1450_v2 = vrot.slane %v1449_v52, 1  ;;  %v1494_v27 = vrot.slane %v1493_v35, 1  ;;  %v1456_v14 = vmax.f32 %v1454_v53, %v1455_v19  ;;  %v1500_v16 = vmax.f32 %v1498_v39, %v1499_v54 }
 0x284   : > { %v1366_v34 = vmul.f32 1.442695, %v1364_v21  ;;  %v1411_v9 = vmul.f32 1.442695, %v1409_v1  ;;  %v1365_v36 = vsub.f32 %v3635_v61, %v1363_v31  ;;  %v1410_v45 = vsub.f32 %v3635_v61, %v1408_v46 }
 0x285   : > { %v1451_v63 = vmax.f32 %v1449_v52, %v1450_v2  ;;  %v1495_v59 = vmax.f32 %v1493_v35, %v1494_v27  ;;  %v1457_v30 = vrot.slane %v1456_v14, 1  ;;  %v1501_v25 = vrot.slane %v1500_v16, 1 }
 0x286   : > { %2598 = vpow2.f32 %v1366_v34  ;;  %v1368_v3 = vmul.f32 1.442695, %v1365_v36  ;;  %v1413_v49 = vmul.f32 1.442695, %v1410_v45 }
 0x287   : > { %2600 = vpow2.f32 %v1411_v9  ;;  %v1459_v13 = vsub.f32 %v3641_v33, %v1451_v63  ;;  %v1503_v50 = vsub.f32 %v3641_v33, %v1495_v59  ;;  %v1458_v29 = vmax.f32 %v1456_v14, %v1457_v30 }
 0x288   : > { %2602 = vpow2.f32 %v1368_v3  ;;  %v1502_v4 = vmax.f32 %v1500_v16, %v1501_v25 }
 0x289   : > { %2604 = vpow2.f32 %v1413_v49  ;;  %v1461_v6 = vmul.f32 1.442695, %v1459_v13  ;;  %v1505_v5 = vmul.f32 1.442695, %v1503_v50  ;;  %v1460_v61 = vsub.f32 %v3647_v24, %v1458_v29 }
 0x28a   : > { %v1504_v58 = vsub.f32 %v3647_v24, %v1502_v4 }
 0x28b   : > { %2606 = vpow2.f32 %v1461_v6  ;;  %v1463_v47 = vmul.f32 1.442695, %v1460_v61 }
 0x28c   : > { %2608 = vpow2.f32 %v1505_v5  ;;  %v1507_v57 = vmul.f32 1.442695, %v1504_v58  ;;  %v1547_v5 = vlaneseq }
 0x28d   : > { %2610 = vpow2.f32 %v1463_v47 }
 0x28e   : > { %2612 = vpow2.f32 %v1507_v57  ;;  %v1548_v57 = vshrl.u32 %v1547_v5, 7 }
 0x293   : > { %v3659_v60 = vpop.eup %2598 }
 0x294   : > { %v3661_v11 = vpop.eup %2600  ;;  %v1370_v33 = vsel %vm1349_vm2, %v3659_v60, 0.0 }
 0x295   : > { %v3665_v62 = vpop.eup %2602  ;;  %v1371_v51 = vrot.slane %v1370_v33, 4  ;;  %v1417_v8 = vrot.slane %v3661_v11, 4 }
 0x296   : > { %v3668_v12 = vpop.eup %2604  ;;  %v1377_v24 = vsel %vm1349_vm2, %v3665_v62, 0.0 }
 0x297   : > { %v1372_v42 = vadd.f32 %v1371_v51, %v1370_v33  ;;  %v1421_v55 = vsel %vm1349_vm2, %v1417_v8, 0.0  ;;  %v1378_v26 = vrot.slane %v1377_v24, 4  ;;  %v1418_v20 = vrot.slane %v3668_v12, 4 }
 0x298   : > { %v3674_v32 = vpop.eup %2606  ;;  %v1422_v0 = vrot.slane %v1421_v55, 4 }
 0x299   : > { %v3676_v48 = vpop.eup %2608  ;;  %v1373_v37 = vrot.slane %v1372_v42, 2  ;;  %v1379_v15 = vadd.f32 %v1378_v26, %v1377_v24  ;;  %v1428_v41 = vsel %vm1349_vm2, %v1418_v20, 0.0  ;;  %v1465_v18 = vsel %vm1349_vm2, %v3674_v32, 0.0 }
 0x29a   : > { %v3681_v43 = vpop.eup %2610  ;;  %v1423_v7 = vadd.f32 %v1422_v0, %v1421_v55  ;;  %v1429_v23 = vrot.slane %v1428_v41, 4  ;;  %v1466_v28 = vrot.slane %v1465_v18, 4  ;;  %v1511_v56 = vrot.slane %v3676_v48, 4 }
 0x29b   : > { %4368 = vst [vmem:[#allocation43_spill] sm:$0xff] %v3681_v43  ;;  %v3684_v10 = vpop.eup %2612  ;;  %v1374_v17 = vadd.f32 %v1373_v37, %v1372_v42  ;;  %v1380_v53 = vrot.slane %v1379_v15, 2  ;;  %v1472_v39 = vsel %vm1349_vm2, %v3681_v43, 0.0  ;;  %v3693_v26 = vsub.s32 0, %v1548_v57 }
 0x29c   : > { %4369 = vst [vmem:[#allocation44_spill] sm:$0xff] %v3684_v10  ;;  %v1424_v44 = vrot.slane %v1423_v7, 2  ;;  %v1430_v40 = vadd.f32 %v1429_v23, %v1428_v41  ;;  %v1467_v22 = vadd.f32 %v1466_v28, %v1465_v18  ;;  %v1515_v38 = vsel %vm1349_vm2, %v1511_v56, 0.0 }
 0x29d   : > { %v1375_v52 = vrot.slane %v1374_v17, 1  ;;  %v1381_v35 = vadd.f32 %v1380_v53, %v1379_v15  ;;  %v1516_v19 = vrot.slane %v1515_v38, 4  ;;  %v1473_v54 = vrot.slane %v1472_v39, 4 }
 0x29e   : > { %v1425_v21 = vadd.f32 %v1424_v44, %v1423_v7  ;;  %v1431_v1 = vrot.slane %v1430_v40, 2  ;;  %v1468_v31 = vrot.slane %v1467_v22, 2  ;;  %v1512_v46 = vrot.slane %v3684_v10, 4  ;;  %v3881_v10 = vld [vmem:[%s3134_s16 + $0x38] sm:$0xff] }
 0x29f   : > { %v1376_v2 = vadd.f32 %v1375_v52, %v1374_v17  ;;  %v1382_v27 = vrot.slane %v1381_v35, 1  ;;  %v1517_v14 = vadd.f32 %v1516_v19, %v1515_v38  ;;  %v1474_v63 = vadd.f32 %v1473_v54, %v1472_v39  ;;  %v3723_v54 = vld [vmem:[%s3704_s9] sm:$0xff]  ;;  %4379 = vst [vmem:[#allocation39_spill] sm:$0xff] %v3881_v10 }
 0x2a0   : > { %v1426_v16 = vrot.slane %v1425_v21, 1  ;;  %v1432_v34 = vadd.f32 %v1431_v1, %v1430_v40  ;;  %v1469_v9 = vadd.f32 %v1468_v31, %v1467_v22  ;;  %v1522_v36 = vsel %vm1349_vm2, %v1512_v46, 0.0  ;;  %v3729_v1 = vld [vmem:[%s3704_s9 + $0x20] sm:$0xff] }
 0x2a1   : > { %2614 = vrcp.f32 %v1376_v2  ;;  %v1383_v45 = vadd.f32 %v1382_v27, %v1381_v35  ;;  %v1523_v3 = vrot.slane %v1522_v36, 4  ;;  %v1518_v49 = vrot.slane %v1517_v14, 2  ;;  %v3736_v27 = vld [vmem:[%s3704_s9 + $0x30] sm:$0xff] }
 0x2a2   : > { %v1427_v59 = vadd.f32 %v1426_v16, %v1425_v21  ;;  %v1433_v30 = vrot.slane %v1432_v34, 1  ;;  %v1470_v25 = vrot.slane %v1469_v9, 1  ;;  %v1475_v4 = vrot.slane %v1474_v63, 2  ;;  %v3726_v21 = vld [vmem:[%s3704_s9 + $0x10] sm:$0xff] }
 0x2a3   : > { %2616 = vrcp.f32 %v1383_v45  ;;  %v1524_v29 = vadd.f32 %v1523_v3, %v1522_v36  ;;  %v1519_v61 = vadd.f32 %v1518_v49, %v1517_v14  ;;  %v3697_v15 = vsub.s32 1, %v1548_v57  ;;  %v3742_v14 = vld [vmem:[%s3124_s12 + $0x10] sm:$0xff]  ;;  %v3749_v36 = vld [vmem:[%s3124_s12 + $0x20] sm:$0xff] }
 0x2a4   : > { %2618 = vrcp.f32 %v1427_v59  ;;  %v1434_v13 = vadd.f32 %v1433_v30, %v1432_v34  ;;  %v1471_v50 = vadd.f32 %v1470_v25, %v1469_v9  ;;  %v1476_v58 = vadd.f32 %v1475_v4, %v1474_v63  ;;  %v3762_v49 = vld [vmem:[%s3134_s16 + $0x10] sm:$0xff] }
 0x2a5   : > { %v1525_v6 = vrot.slane %v1524_v29, 2  ;;  %v1520_v33 = vrot.slane %v1519_v61, 1  ;;  %v3706_v23 = vsub.s32 2, %v1548_v57  ;;  %v3708_v28 = vsub.s32 3, %v1548_v57 }
 0x2a6   : > { %2620 = vrcp.f32 %v1434_v13  ;;  %v1477_v51 = vrot.slane %v1476_v58, 1  ;;  %v3712_v39 = vsub.s32 4, %v1548_v57  ;;  %v3714_v44 = vsub.s32 5, %v1548_v57 }
 0x2a7   : > { %2622 = vrcp.f32 %v1471_v50  ;;  %v1526_v47 = vadd.f32 %v1525_v6, %v1524_v29  ;;  %v3695_v20 = vadd.f32 %v1520_v33, %v1519_v61  ;;  %v3718_v52 = vsub.s32 6, %v1548_v57  ;;  %v3878_v6 = vld [vmem:[%s3134_s16 + $0x28] sm:$0xff] }
 0x2a8   : > { %v3699_v18 = vadd.f32 %v1477_v51, %v1476_v58  ;;  %4371 = vst [vmem:[#allocation41_spill] sm:$0xff] %v3712_v39  ;;  %4372 = vst [vmem:[#allocation33_spill] sm:$0xff] %v3714_v44  ;;  %v3744_v16 = vsub.s32 7, %v1548_v57 }
 0x2a9   : > { %v1527_v24 = vrot.slane %v1526_v47, 1  ;;  %4373 = vst [vmem:[#allocation37_spill] sm:$0xff] %v3718_v52  ;;  %2624 = vrcp.f32 %v3695_v20 }
 0x2aa   : > { %2626 = vrcp.f32 %v3699_v18 }
 0x2ab   : > { %v3710_v56 = vadd.f32 %v1527_v24, %v1526_v47 }
 0x2ad   : > { %2628 = vrcp.f32 %v3710_v56 }
 0x2ae   : > { %v2615_v8 = vpop.eup %2614 }
 0x2af   : > { %v1386_v42 = vmul.f32 %v2615_v8, %v1376_v2 }
 0x2b0   : > { %v2617_v55 = vpop.eup %2616 }
 0x2b1   : > { %v2619_v0 = vpop.eup %2618  ;;  %v1388_v37 = vsub.f32 2.0, %v1386_v42  ;;  %v1387_v41 = vmul.f32 %v2617_v55, %v1383_v45  ;;  %v3752_v45 = vld [vmem:[%s3124_s12 + $0x30] sm:$0xff] }
 0x2b2   : > { %v1437_v7 = vmul.f32 %v2619_v0, %v1427_v59  ;;  %v3756_v59 = vld [vmem:[%s3134_s16] sm:$0xff] }
 0x2b3   : > { %v2621_v17 = vpop.eup %2620  ;;  %v1390_v53 = vmul.f32 %v2615_v8, %v1388_v37  ;;  %v1389_v40 = vsub.f32 2.0, %v1387_v41 }
 0x2b4   : > { %v3716_v22 = vpop.eup %2622  ;;  %v1439_v38 = vsub.f32 2.0, %v1437_v7  ;;  %v1438_v35 = vmul.f32 %v2621_v17, %v1434_v13  ;;  %v3765_v13 = vld [vmem:[%s3134_s16 + $0x20] sm:$0xff] }
 0x2b5   : > { %v1392_v19 = vmul.f32 %v3659_v60, %v1390_v53  ;;  %v1391_v31 = vmul.f32 %v2617_v55, %v1389_v40  ;;  %v3732_v46 = vmul.f32 %v3716_v22, %v1471_v50  ;;  %v3739_v60 = vld [vmem:[%s3124_s12] sm:$0xff]  ;;  %v3768_v50 = vld [vmem:[%s3134_s16 + $0x30] sm:$0xff] }
 0x2b6   : > { %v1441_v2 = vmul.f32 %v2619_v0, %v1439_v38  ;;  %v1440_v34 = vsub.f32 2.0, %v1438_v35  ;;  %4374 = vst [vmem:[#allocation36_spill] sm:$0xff] %v3768_v50  ;;  %v2630_v7 = vld [vmem:[%s3143_s13] sm:$0xff]  ;;  %v2631_v53 = vld [vmem:[%s3143_s13 + $0x10] sm:$0xff] }
 0x2b7   : > { %v1550_v9 = vrot.slane %v1392_v19, %v3693_v26  ;;  %v1574_v63 = vrot.slane %v1392_v19, %v3697_v15  ;;  %v1606_v30 = vrot.slane %v1392_v19, %v3706_v23  ;;  %v1630_v25 = vrot.slane %v1392_v19, %v3708_v28  ;;  %v2632_v38 = vld [vmem:[%s3143_s13 + $0x20] sm:$0xff]  ;;  %v2633_v19 = vld [vmem:[%s3143_s13 + $0x30] sm:$0xff] }
 0x2b8   : > { %v1443_v3 = vmul.f32 %v3661_v11, %v1441_v2  ;;  %v3771_v29 = vmul.f32 %v3665_v62, %v1391_v31  ;;  %v3773_v4 = vmul.f32 %v2621_v17, %v1440_v34 }
 0x2b9   : > { %v1555_v5 = vmul.f32 %v1550_v9, %v3723_v54  ;;  %v1557_v61 = vmul.f32 %v1550_v9, %v3726_v21  ;;  %v1559_v11 = vmul.f32 %v1550_v9, %v3729_v1  ;;  %v1561_v58 = vmul.f32 %v1550_v9, %v3736_v27 }
 0x2ba   : > { %v1579_v47 = vmul.f32 %v1574_v63, %v3739_v60  ;;  %v1581_v62 = vmul.f32 %v1574_v63, %v3742_v14  ;;  %v1583_v57 = vmul.f32 %v1574_v63, %v3749_v36  ;;  %v1585_v33 = vmul.f32 %v1574_v63, %v3752_v45 }
 0x2bb   : > { %v1611_v51 = vmul.f32 %v1606_v30, %v3756_v59  ;;  %v1613_v8 = vmul.f32 %v1606_v30, %v3762_v49  ;;  %v1615_v24 = vmul.f32 %v1606_v30, %v3765_v13  ;;  %v1617_v42 = vmul.f32 %v1606_v30, %v3768_v50 }
 0x2bc   : > { %v1587_v55 = vadd.f32 %v1579_v47, %v1555_v5  ;;  %v1589_v0 = vadd.f32 %v1581_v62, %v1557_v61  ;;  %v1591_v37 = vadd.f32 %v1583_v57, %v1559_v11  ;;  %v1593_v41 = vadd.f32 %v1585_v33, %v1561_v58  ;;  %v3796_v33 = vpop.eup %2624 }
 0x2bd   : > { %v1635_v17 = vmul.f32 %v2630_v7, %v1630_v25  ;;  %v1637_v40 = vmul.f32 %v2631_v53, %v1630_v25  ;;  %v1639_v35 = vmul.f32 %v2632_v38, %v1630_v25  ;;  %v1641_v31 = vmul.f32 %v2633_v19, %v1630_v25  ;;  %v3819_v7 = vld [vmem:[%s3143_s13 + $0x10] sm:$0xff] }
 0x2be   : > { %v1619_v2 = vadd.f32 %v1611_v51, %v1587_v55  ;;  %v1621_v34 = vadd.f32 %v1613_v8, %v1589_v0  ;;  %v1623_v9 = vadd.f32 %v1615_v24, %v1591_v37  ;;  %v1625_v63 = vadd.f32 %v1617_v42, %v1593_v41  ;;  %v3803_v42 = vld [vmem:[%s3143_s13] sm:$0xff]  ;;  %4376 = vst [vmem:[#allocation34_spill] sm:$0xff] %v3819_v7  ;;  %v3825_v53 = vld [vmem:[%s3143_s13 + $0x30] sm:$0xff] }
 0x2bf   : > { %v1670_v30 = vrot.slane %v1443_v3, %v3712_v39  ;;  %v1694_v5 = vrot.slane %v1443_v3, %v3714_v44  ;;  %v1726_v61 = vrot.slane %v1443_v3, %v3718_v52  ;;  %v1758_v11 = vrot.slane %v1443_v3, %v3744_v16  ;;  %4375 = vst [vmem:[#allocation35_spill] sm:$0xff] %v3803_v42  ;;  %v3805_v3 = vpop.eup %2626 }
 0x2c0   : > { %v1643_v58 = vadd.f32 %v1635_v17, %v1619_v2  ;;  %v1645_v47 = vadd.f32 %v1637_v40, %v1621_v34  ;;  %v1647_v62 = vadd.f32 %v1639_v35, %v1623_v9  ;;  %v1649_v57 = vadd.f32 %v1641_v31, %v1625_v63  ;;  %v3822_v17 = vld [vmem:[%s3143_s13 + $0x20] sm:$0xff]  ;;  %4378 = vst [vmem:[#allocation40_spill] sm:$0xff] %v3825_v53  ;;  %v3827_v40 = vpop.eup %2628 }
 0x2c1   : > { %v1675_v25 = vmul.f32 %v1670_v30, %v3723_v54  ;;  %v1677_v51 = vmul.f32 %v1670_v30, %v3726_v21  ;;  %v1679_v8 = vmul.f32 %v1670_v30, %v3729_v1  ;;  %v1681_v24 = vmul.f32 %v1670_v30, %v3736_v27  ;;  %4377 = vst [vmem:[#allocation42_spill] sm:$0xff] %v3822_v17 }
 0x2c2   : > { %1651 = vst [vmem:[%s3808_s8] sm:$0xff] %v1643_v58  ;;  %1653 = vst [vmem:[%s3808_s8 + $0x10] sm:$0xff] %v1645_v47  ;;  %v1699_v55 = vmul.f32 %v1694_v5, %v3739_v60  ;;  %v1701_v0 = vmul.f32 %v1694_v5, %v3742_v14  ;;  %v1703_v37 = vmul.f32 %v1694_v5, %v3749_v36 }
 0x2c3   : > { %1655 = vst [vmem:[%s3808_s8 + $0x20] sm:$0xff] %v1647_v62  ;;  %1657 = vst [vmem:[%s3808_s8 + $0x30] sm:$0xff] %v1649_v57  ;;  %v1705_v41 = vmul.f32 %v1694_v5, %v3752_v45  ;;  %v1731_v38 = vmul.f32 %v1726_v61, %v3756_v59  ;;  %v1733_v35 = vmul.f32 %v1726_v61, %v3762_v49  ;;  %v3838_v62 = vld [vmem:[%s3704_s9 + $0x8] sm:$0xff] }
 0x2c4   : > { %v1735_v19 = vmul.f32 %v1726_v61, %v3765_v13  ;;  %v1737_v31 = vmul.f32 %v1726_v61, %v3768_v50  ;;  %v1707_v2 = vadd.f32 %v1699_v55, %v1675_v25  ;;  %v1709_v34 = vadd.f32 %v1701_v0, %v1677_v51  ;;  %v3841_v61 = vld [vmem:[%s3704_s9 + $0x18] sm:$0xff]  ;;  %v3844_v57 = vld [vmem:[%s3704_s9 + $0x28] sm:$0xff] }
 0x2c5   : > { %v1711_v9 = vadd.f32 %v1703_v37, %v1679_v8  ;;  %v1713_v63 = vadd.f32 %v1705_v41, %v1681_v24  ;;  %v1763_v30 = vmul.f32 %v1758_v11, %v3803_v42  ;;  %v1765_v5 = vmul.f32 %v1758_v11, %v3819_v7  ;;  %v3847_v55 = vld [vmem:[%s3704_s9 + $0x38] sm:$0xff]  ;;  %v3850_v0 = vld [vmem:[%s3124_s12 + $0x8] sm:$0xff] }
 0x2c6   : > { %v1767_v58 = vmul.f32 %v1758_v11, %v3822_v17  ;;  %v1769_v47 = vmul.f32 %v1758_v11, %v3825_v53  ;;  %v1739_v25 = vadd.f32 %v1731_v38, %v1707_v2  ;;  %v1741_v51 = vadd.f32 %v1733_v35, %v1709_v34  ;;  %v3853_v37 = vld [vmem:[%s3124_s12 + $0x18] sm:$0xff]  ;;  %v3862_v38 = vld [vmem:[%s3124_s12 + $0x28] sm:$0xff] }
 0x2c7   : > { %v1743_v8 = vadd.f32 %v1735_v19, %v1711_v9  ;;  %v1745_v24 = vadd.f32 %v1737_v31, %v1713_v63  ;;  %v3857_v11 = vmul.f32 %v3668_v12, %v3773_v4  ;;  %v1554_v41 = vrot.slane %v3771_v29, %v3693_v26  ;;  %v3865_v35 = vld [vmem:[%s3124_s12 + $0x38] sm:$0xff]  ;;  %v3870_v31 = vld [vmem:[%s3134_s16 + $0x8] sm:$0xff]  ;;  %s3888_s12 = scalar_lea.vmem [#allocation9], %s3120_s28 }
 0x2c8   : > { %v1578_v19 = vrot.slane %v3771_v29, %v3697_v15  ;;  %v1610_v2 = vrot.slane %v3771_v29, %v3706_v23  ;;  %v1771_v34 = vadd.f32 %v1763_v30, %v1739_v25  ;;  %v1773_v9 = vadd.f32 %v1765_v5, %v1741_v51  ;;  %v3875_v63 = vld [vmem:[%s3134_s16 + $0x18] sm:$0xff]  ;;  %s3911_s16 = sshll.u32 %s2884_s20, 10 }
 0x2c9   : > { %v1775_v12 = vadd.f32 %v1767_v58, %v1743_v8  ;;  %v1777_v4 = vadd.f32 %v1769_v47, %v1745_v24  ;;  %v1556_v43 = vmul.f32 %v1554_v41, %v3838_v62  ;;  %v1558_v53 = vmul.f32 %v1554_v41, %v3841_v61  ;;  %s3926_s24 = scalar_lea.hbm %s4380_s25, %s3911_s16 }
 0x2ca   : > { %v1560_v17 = vmul.f32 %v1554_v41, %v3844_v57  ;;  %v1562_v7 = vmul.f32 %v1554_v41, %v3847_v55  ;;  %1779 = vst [vmem:[%s3888_s12] sm:$0xff] %v1771_v34  ;;  %1781 = vst [vmem:[%s3888_s12 + $0x10] sm:$0xff] %v1773_v9  ;;  %v1580_v30 = vmul.f32 %v1578_v19, %v3850_v0 }
 0x2cb   : > { %1783 = vst [vmem:[%s3888_s12 + $0x20] sm:$0xff] %v1775_v12  ;;  %1785 = vst [vmem:[%s3888_s12 + $0x30] sm:$0xff] %v1777_v4  ;;  %v1582_v5 = vmul.f32 %v1578_v19, %v3853_v37  ;;  %v1584_v58 = vmul.f32 %v1578_v19, %v3862_v38  ;;  %v1586_v47 = vmul.f32 %v1578_v19, %v3865_v35 }
 0x2cc   : > { %v1612_v25 = vmul.f32 %v1610_v2, %v3870_v31  ;;  %v1614_v51 = vmul.f32 %v1610_v2, %v3875_v63  ;;  %v1616_v8 = vmul.f32 %v1610_v2, %v3878_v6  ;;  %v1618_v24 = vmul.f32 %v1610_v2, %v3881_v10 }
 0x2cd   : > { %v1588_v41 = vadd.f32 %v1580_v30, %v1556_v43  ;;  %v1590_v34 = vadd.f32 %v1582_v5, %v1558_v53  ;;  %v1592_v9 = vadd.f32 %v1584_v58, %v1560_v17  ;;  %v1594_v12 = vadd.f32 %v1586_v47, %v1562_v7  ;;  %v2634_v7 = vld [vmem:[%s3143_s13 + $0x8] sm:$0xff]  ;;  %v2635_v17 = vld [vmem:[%s3143_s13 + $0x18] sm:$0xff] }
 0x2ce   : > { %v1634_v19 = vrot.slane %v3771_v29, %v3708_v28  ;;  %v1674_v4 = vrot.slane %v3857_v11, %v3712_v39  ;;  %v1698_v42 = vrot.slane %v3857_v11, %v3714_v44  ;;  %v1730_v50 = vrot.slane %v3857_v11, %v3718_v52  ;;  %v2636_v58 = vld [vmem:[%s3143_s13 + $0x28] sm:$0xff]  ;;  %v2637_v39 = vld [vmem:[%s3143_s13 + $0x38] sm:$0xff] }
 0x2cf   : > { %v1620_v2 = vadd.f32 %v1612_v25, %v1588_v41  ;;  %v1622_v43 = vadd.f32 %v1614_v51, %v1590_v34  ;;  %v1624_v30 = vadd.f32 %v1616_v8, %v1592_v9  ;;  %v1626_v53 = vadd.f32 %v1618_v24, %v1594_v12 }
 0x2d0   : > { %v1636_v29 = vmul.f32 %v2634_v7, %v1634_v19  ;;  %v1638_v5 = vmul.f32 %v2635_v17, %v1634_v19  ;;  %v1640_v47 = vmul.f32 %v2636_v58, %v1634_v19  ;;  %v1642_v44 = vmul.f32 %v2637_v39, %v1634_v19  ;;  %v3946_v7 = vld [vmem:[%s3143_s13 + $0x18] sm:$0xff] }
 0x2d1   : > { %v1676_v52 = vmul.f32 %v1674_v4, %v3838_v62  ;;  %v1678_v25 = vmul.f32 %v1674_v4, %v3841_v61  ;;  %v1680_v51 = vmul.f32 %v1674_v4, %v3844_v57  ;;  %v1682_v8 = vmul.f32 %v1674_v4, %v3847_v55  ;;  %4383 = vst [vmem:[#allocation30_spill] sm:$0xff] %v3946_v7 }
 0x2d2   : > { %v1644_v24 = vadd.f32 %v1636_v29, %v1620_v2  ;;  %v1646_v41 = vadd.f32 %v1638_v5, %v1622_v43  ;;  %v1648_v34 = vadd.f32 %v1640_v47, %v1624_v30  ;;  %v1650_v9 = vadd.f32 %v1642_v44, %v1626_v53  ;;  %v3935_v2 = vld [vmem:[%s3143_s13 + $0x8] sm:$0xff]  ;;  %v3952_v29 = vld [vmem:[%s3143_s13 + $0x38] sm:$0xff] }
 0x2d3   : > { %v1700_v39 = vmul.f32 %v1698_v42, %v3850_v0  ;;  %v1702_v12 = vmul.f32 %v1698_v42, %v3853_v37  ;;  %v1704_v19 = vmul.f32 %v1698_v42, %v3862_v38  ;;  %v1706_v4 = vmul.f32 %v1698_v42, %v3865_v35  ;;  %4381 = vst [vmem:[#allocation32_spill] sm:$0xff] %v3935_v2  ;;  %v3949_v42 = vld [vmem:[%s3143_s13 + $0x28] sm:$0xff] }
 0x2d4   : > { %1652 = vst [vmem:[%s3808_s8 + $0x8] sm:$0xff] %v1644_v24  ;;  %1654 = vst [vmem:[%s3808_s8 + $0x18] sm:$0xff] %v1646_v41  ;;  %v1732_v44 = vmul.f32 %v1730_v50, %v3870_v31  ;;  %v1734_v43 = vmul.f32 %v1730_v50, %v3875_v63  ;;  %v1736_v30 = vmul.f32 %v1730_v50, %v3878_v6 }
 0x2d5   : > { %1656 = vst [vmem:[%s3808_s8 + $0x28] sm:$0xff] %v1648_v34  ;;  %1658 = vst [vmem:[%s3808_s8 + $0x38] sm:$0xff] %v1650_v9  ;;  %v1738_v53 = vmul.f32 %v1730_v50, %v3881_v10  ;;  %v1708_v17 = vadd.f32 %v1700_v39, %v1676_v52  ;;  %v1710_v5 = vadd.f32 %v1702_v12, %v1678_v25 }
 0x2d6   : > { %4384 = vst [vmem:[#allocation38_spill] sm:$0xff] %v3949_v42  ;;  %4385 = vst [vmem:[#allocation31_spill] sm:$0xff] %v3952_v29  ;;  %v1712_v58 = vadd.f32 %v1704_v19, %v1680_v51  ;;  %v1714_v47 = vadd.f32 %v1706_v4, %v1682_v8 }
 0x2d7   : > { %2735 = shalt.err (!%p2732_p1)
}
 0x2d8   : > { %s2736_s13 = scalar_lea.hbm %s3926_s24, 1024  ;;  %s2740_s9 = scalar_lea.hbm %s4380_s25, 2048 }
 0x2d9   : > { %p2737_p2 = scmp.ne.s32.totalorder %s3926_s24, %s2736_s13  ;;  %p2741_p7 = scmp.lt.s32.totalorder %s3926_s24, %s4380_s25 }
 0x2da   : > { %p2742_p8 = scmp.lt.s32.totalorder %s2740_s9, %s2736_s13 }
 0x2db   : > { %p2738_p5 = pnand %p2737_p2, %p3022_p9 }
 0x2dc   : > { %p2743_p0 = por %p2742_p8, %p2741_p7 }
 0x2dd   : > { %p2739_p6 = pneg %p2738_p5 }
 0x2df   : > { %p2744_p3 = pnand %p2743_p0, %p2739_p6 }
 0x2e1   : > { %2747 = shalt.err (!%p2744_p3)
}
 0x2e2   : > { %s2902_s26 = smov 256   ;;  %s2903_s2 = smov 16   ;;  %v1762_v52 = vrot.slane %v3857_v11, %v3744_v16  ;;  %v4386_v50 = vsub.f32 2.0, %v3732_v46  ;;  %v1531_v51 = vmul.f32 %v3796_v33, %v3695_v20  ;;  %v1482_v8 = vmul.f32 %v3805_v3, %v3699_v18 }
 0x2e3   : > { %2445 = dma.vmem_to_hbm [thread:$0]  (%p3022_p9), %s3928_s10, 1024, %s3926_s24, %s2044_s0, %s2902_s26, %s2902_s26, %s2903_s2   ;;  %v1740_v24 = vadd.f32 %v1732_v44, %v1708_v17  ;;  %v1742_v41 = vadd.f32 %v1734_v43, %v1710_v5  ;;  %v1744_v34 = vadd.f32 %v1736_v30, %v1712_v58  ;;  %v1746_v9 = vadd.f32 %v1738_v53, %v1714_v47 }
 0x2e4   : > { %v1485_v25 = vmul.f32 %v3716_v22, %v4386_v50  ;;  %s2092_s27 = sshll.u32 %s3888_s12, 4  ;;  %v1764_v39 = vmul.f32 %v1762_v52, %v3935_v2  ;;  %v1766_v11 = vmul.f32 %v1762_v52, %v3946_v7  ;;  %v1768_v46 = vmul.f32 %v1762_v52, %v3949_v42  ;;  %s4387_s0 = sld [smem:[#allocation48_spill]]  ;;  %s4001_s27 = int_to_ptr.vmem [resolvable:$true] %s2092_s27 }
 0x2e5   : > { %v1770_v22 = vmul.f32 %v1762_v52, %v3952_v29  ;;  %v1533_v18 = vsub.f32 2.0, %v1531_v51  ;;  %v1484_v12 = vsub.f32 2.0, %v1482_v8  ;;  %s2748_s29 = scalar_lea.vmem %s4001_s27, 1024  ;;  %s2904_s13 = smov [#allocation9]  }
 0x2e6   : > { %v1487_v20 = vmul.f32 %v3674_v32, %v1485_v25  ;;  %v1772_v19 = vadd.f32 %v1764_v39, %v1740_v24  ;;  %v1774_v4 = vadd.f32 %v1766_v11, %v1742_v41  ;;  %v1776_v44 = vadd.f32 %v1768_v46, %v1744_v34  ;;  %p2749_p4 = scmp.ne.s32.totalorder %s4001_s27, %s2748_s29  ;;  %s2752_s11 = sshll.u32 %s2904_s13, 4  ;;  %s2753_s11 = int_to_ptr.vmem [resolvable:$false] %s2752_s11 }
 0x2e7   : > { %v1778_v43 = vadd.f32 %v1770_v22, %v1746_v9  ;;  %v1535_v30 = vmul.f32 %v3796_v33, %v1533_v18  ;;  %v4013_v58 = vmul.f32 %v3805_v3, %v1484_v12  ;;  %v4017_v33 = vmul.f32 %v3827_v40, %v3710_v56  ;;  %s2754_s21 = scalar_lea.vmem %s2753_s11, 2048  ;;  %p2755_p12 = scmp.lt.s32.totalorder %s4001_s27, %s2753_s11 }
 0x2e8   : > { %v1798_v32 = vrot.slane %v1487_v20, %v3693_v26  ;;  %v1822_v53 = vrot.slane %v1487_v20, %v3697_v15  ;;  %v1854_v17 = vrot.slane %v1487_v20, %v3706_v23  ;;  %1780 = vst [vmem:[%s3888_s12 + $0x8] sm:$0xff] %v1772_v19  ;;  %1782 = vst [vmem:[%s3888_s12 + $0x18] sm:$0xff] %v1774_v4  ;;  %p2750_p10 = pnand %p2749_p4, %p3022_p9  ;;  %p2756_p1 = scmp.lt.s32.totalorder %s2754_s21, %s2748_s29 }
 0x2e9   : > { %1784 = vst [vmem:[%s3888_s12 + $0x28] sm:$0xff] %v1776_v44  ;;  %1786 = vst [vmem:[%s3888_s12 + $0x38] sm:$0xff] %v1778_v43  ;;  %v1886_v5 = vrot.slane %v1487_v20, %v3708_v28  ;;  %v1537_v47 = vmul.f32 %v3676_v48, %v1535_v30  ;;  %s4025_s12 = scalar_lea.sflag [#allocation10], %s482_s30 }
 0x2ea   : > { %s3999_s14 = scalar_lea.hbm %s4387_s0, %s3911_s16  ;;  %v1803_v52 = vmul.f32 %v1798_v32, %v3723_v54  ;;  %v1805_v50 = vmul.f32 %v1798_v32, %v3726_v21  ;;  %v1807_v25 = vmul.f32 %v1798_v32, %v3729_v1  ;;  %p2751_p13 = pneg %p2750_p10 }
 0x2eb   : > { %p2757_p2 = por %p2756_p1, %p2755_p12 }
 0x2ed   : > { %p2758_p5 = pnand %p2757_p2, %p2751_p13 }
 0x2ef   : > { %2761 = shalt.err (!%p2758_p5)
}
 0x2f0   : > { %s2762_s23 = scalar_lea.hbm %s3999_s14, 1024  ;;  %s2766_s8 = scalar_lea.hbm %s4387_s0, 2048 }
 0x2f1   : > { %p2763_p6 = scmp.ne.s32.totalorder %s3999_s14, %s2762_s23  ;;  %p2767_p0 = scmp.lt.s32.totalorder %s3999_s14, %s4387_s0 }
 0x2f2   : > { %p2768_p3 = scmp.lt.s32.totalorder %s2766_s8, %s2762_s23 }
 0x2f3   : > { %p2764_p7 = pnand %p2763_p6, %p3022_p9 }
 0x2f4   : > { %p2769_p4 = por %p2768_p3, %p2767_p0 }
 0x2f5   : > { %p2765_p8 = pneg %p2764_p7 }
 0x2f7   : > { %p2770_p10 = pnand %p2769_p4, %p2765_p8 }
 0x2f9   : > { %2773 = shalt.err (!%p2770_p10)
}
 0x2fa   : > { %2446 = dma.vmem_to_hbm [thread:$0]  (%p3022_p9), %s4001_s27, 1024, %s3999_s14, %s4025_s12, %s2902_s26, %s2902_s26, %s2903_s2   ;;  %v1809_v48 = vmul.f32 %v1798_v32, %v3736_v27  ;;  %v1827_v56 = vmul.f32 %v1822_v53, %v3739_v60  ;;  %v1829_v3 = vmul.f32 %v1822_v53, %v3742_v14  ;;  %v1831_v51 = vmul.f32 %v1822_v53, %v3749_v36  ;;  %v4388_v46 = vld [vmem:[#allocation36_spill] sm:$0xff]  ;;  %v4389_v18 = vld [vmem:[#allocation35_spill] sm:$0xff]  ;;  %v4390_v19 = vld [vmem:[#allocation34_spill] sm:$0xff] }
 0x2fb   : > { %v1833_v8 = vmul.f32 %v1822_v53, %v3752_v45  ;;  %v1859_v24 = vmul.f32 %v1854_v17, %v3756_v59  ;;  %v1861_v41 = vmul.f32 %v1854_v17, %v3762_v49  ;;  %v1863_v34 = vmul.f32 %v1854_v17, %v3765_v13  ;;  %v4391_v44 = vld [vmem:[#allocation42_spill] sm:$0xff]  ;;  %v4392_v29 = vld [vmem:[#allocation40_spill] sm:$0xff]  ;;  %v4393_v2 = vld [vmem:[#allocation41_spill] sm:$0xff]  ;;  %s4072_s27 = scalar_lea.vmem [#allocation11], %s3120_s28  ;;  %s4098_s24 = scalar_lea.vmem [#allocation12], %s3120_s28 }
 0x2fc   : > { %v1835_v9 = vadd.f32 %v1827_v56, %v1803_v52  ;;  %v1837_v39 = vadd.f32 %v1829_v3, %v1805_v50  ;;  %v1839_v11 = vadd.f32 %v1831_v51, %v1807_v25  ;;  %v1865_v22 = vmul.f32 %v1854_v17, %v4388_v46  ;;  %v4394_v50 = vld [vmem:[#allocation33_spill] sm:$0xff]  ;;  %s2110_s28 = sshll.u32 %s4072_s27, 4  ;;  %s4403_s13 = sld [smem:[#allocation49_spill]]  ;;  %s4134_s28 = int_to_ptr.vmem [resolvable:$true] %s2110_s28 }
 0x2fd   : > { %v1841_v20 = vadd.f32 %v1833_v8, %v1809_v48  ;;  %v1891_v12 = vmul.f32 %v1886_v5, %v4389_v18  ;;  %v1893_v4 = vmul.f32 %v1886_v5, %v4390_v19  ;;  %v1895_v43 = vmul.f32 %v1886_v5, %v4391_v44  ;;  %v4395_v56 = vld [vmem:[#allocation37_spill] sm:$0xff]  ;;  %s2774_s21 = scalar_lea.vmem %s4134_s28, 1024  ;;  %s2905_s23 = smov [#allocation11]  }
 0x2fe   : > { %v1867_v30 = vadd.f32 %v1859_v24, %v1835_v9  ;;  %v1869_v32 = vadd.f32 %v1861_v41, %v1837_v39  ;;  %v1871_v53 = vadd.f32 %v1863_v34, %v1839_v11  ;;  %v1897_v42 = vmul.f32 %v1886_v5, %v4392_v29  ;;  %p2775_p13 = scmp.ne.s32.totalorder %s4134_s28, %s2774_s21  ;;  %s2778_s30 = sshll.u32 %s2905_s23, 4  ;;  %s2779_s30 = int_to_ptr.vmem [resolvable:$false] %s2778_s30 }
 0x2ff   : > { %v1873_v7 = vadd.f32 %v1865_v22, %v1841_v20  ;;  %v1926_v52 = vrot.slane %v1537_v47, %v4393_v2  ;;  %v1950_v25 = vrot.slane %v1537_v47, %v4394_v50  ;;  %v1982_v17 = vrot.slane %v1537_v47, %v4395_v56  ;;  %s2780_s9 = scalar_lea.vmem %s2779_s30, 2048  ;;  %p2781_p2 = scmp.lt.s32.totalorder %s4134_s28, %s2779_s30 }
 0x300   : > { %v1899_v48 = vadd.f32 %v1891_v12, %v1867_v30  ;;  %v1901_v3 = vadd.f32 %v1893_v4, %v1869_v32  ;;  %v1903_v51 = vadd.f32 %v1895_v43, %v1871_v53  ;;  %v2014_v8 = vrot.slane %v1537_v47, %v3744_v16  ;;  %v4396_v4 = vld [vmem:[#allocation43_spill] sm:$0xff]  ;;  %p2776_p12 = pnand %p2775_p13, %p3022_p9  ;;  %p2782_p5 = scmp.lt.s32.totalorder %s2780_s9, %s2774_s21 }
 0x301   : > { %v1905_v10 = vadd.f32 %v1897_v42, %v1873_v7  ;;  %v1931_v24 = vmul.f32 %v1926_v52, %v3723_v54  ;;  %v1933_v41 = vmul.f32 %v1926_v52, %v3726_v21  ;;  %v1935_v34 = vmul.f32 %v1926_v52, %v3729_v1 }
 0x302   : > { %1907 = vst [vmem:[%s4072_s27] sm:$0xff] %v1899_v48  ;;  %1909 = vst [vmem:[%s4072_s27 + $0x10] sm:$0xff] %v1901_v3  ;;  %v1937_v5 = vmul.f32 %v1926_v52, %v3736_v27  ;;  %v1955_v47 = vmul.f32 %v1950_v25, %v3739_v60  ;;  %v1957_v7 = vmul.f32 %v1950_v25, %v3742_v14  ;;  %v1534_v9 = vsub.f32 2.0, %v4017_v33  ;;  %s4132_s11 = scalar_lea.hbm %s4403_s13, %s3911_s16  ;;  %p2777_p1 = pneg %p2776_p12 }
 0x303   : > { %1911 = vst [vmem:[%s4072_s27 + $0x20] sm:$0xff] %v1903_v51  ;;  %v1959_v54 = vmul.f32 %v1950_v25, %v3749_v36  ;;  %1913 = vst [vmem:[%s4072_s27 + $0x30] sm:$0xff] %v1905_v10  ;;  %v1961_v21 = vmul.f32 %v1950_v25, %v3752_v45  ;;  %v1987_v1 = vmul.f32 %v1982_v17, %v3756_v59  ;;  %p2783_p6 = por %p2782_p5, %p2781_p2 }
 0x304   : > { %v1989_v42 = vmul.f32 %v1982_v17, %v3762_v49  ;;  %v1963_v39 = vadd.f32 %v1955_v47, %v1931_v24  ;;  %v1965_v11 = vadd.f32 %v1957_v7, %v1933_v41  ;;  %v1991_v27 = vmul.f32 %v1982_v17, %v3765_v13  ;;  %v4398_v24 = vld [vmem:[#allocation39_spill] sm:$0xff] }
 0x305   : > { %v1967_v22 = vadd.f32 %v1959_v54, %v1935_v34  ;;  %v1969_v20 = vadd.f32 %v1961_v21, %v1937_v5  ;;  %v1993_v60 = vmul.f32 %v1982_v17, %v4388_v46  ;;  %v2019_v14 = vmul.f32 %v2014_v8, %v4389_v18  ;;  %v4399_v54 = vld [vmem:[#allocation32_spill] sm:$0xff]  ;;  %p2784_p7 = pnand %p2783_p6, %p2777_p1 }
 0x306   : > { %v2021_v10 = vmul.f32 %v2014_v8, %v4390_v19  ;;  %v1995_v36 = vadd.f32 %v1987_v1, %v1963_v39  ;;  %v1997_v45 = vadd.f32 %v1989_v42, %v1965_v11  ;;  %v2023_v49 = vmul.f32 %v2014_v8, %v4391_v44  ;;  %v4400_v1 = vld [vmem:[#allocation30_spill] sm:$0xff]  ;;  %v4402_v11 = vld [vmem:[#allocation31_spill] sm:$0xff] }
 0x307   : > { %v1999_v59 = vadd.f32 %v1991_v27, %v1967_v22  ;;  %v2001_v12 = vadd.f32 %v1993_v60, %v1969_v20  ;;  %v2025_v33 = vmul.f32 %v2014_v8, %v4392_v29  ;;  %v1488_v43 = vmul.f32 %v4396_v4, %v4013_v58  ;;  %v4397_v29 = vld [vmem:[#allocation44_spill] sm:$0xff] }
 0x308   : > { %v1536_v13 = vmul.f32 %v3827_v40, %v1534_v9  ;;  %v2027_v30 = vadd.f32 %v2019_v14, %v1995_v36  ;;  %v2029_v46 = vadd.f32 %v2021_v10, %v1997_v45  ;;  %v4401_v9 = vld [vmem:[#allocation38_spill] sm:$0xff] }
 0x309   : > { %v2031_v32 = vadd.f32 %v2023_v49, %v1999_v59  ;;  %v2033_v18 = vadd.f32 %v2025_v33, %v2001_v12  ;;  %v1802_v53 = vrot.slane %v1488_v43, %v3693_v26  ;;  %v1826_v19 = vrot.slane %v1488_v43, %v3697_v15 }
 0x30a   : > { %2035 = vst [vmem:[%s4098_s24] sm:$0xff] %v2027_v30  ;;  %2037 = vst [vmem:[%s4098_s24 + $0x10] sm:$0xff] %v2029_v46  ;;  %v1538_v58 = vmul.f32 %v4397_v29, %v1536_v13  ;;  %v1858_v40 = vrot.slane %v1488_v43, %v3706_v23  ;;  %v1890_v44 = vrot.slane %v1488_v43, %v3708_v28 }
 0x30b   : > { %2039 = vst [vmem:[%s4098_s24 + $0x20] sm:$0xff] %v2031_v32  ;;  %2041 = vst [vmem:[%s4098_s24 + $0x30] sm:$0xff] %v2033_v18  ;;  %v1804_v26 = vmul.f32 %v1802_v53, %v3838_v62  ;;  %v1806_v15 = vmul.f32 %v1802_v53, %v3841_v61  ;;  %v1808_v52 = vmul.f32 %v1802_v53, %v3844_v57 }
 0x30c   : > { %v1810_v25 = vmul.f32 %v1802_v53, %v3847_v55  ;;  %v1828_v17 = vmul.f32 %v1826_v19, %v3850_v0  ;;  %v1830_v48 = vmul.f32 %v1826_v19, %v3853_v37  ;;  %v1832_v3 = vmul.f32 %v1826_v19, %v3862_v38 }
 0x30d   : > { %v1834_v23 = vmul.f32 %v1826_v19, %v3865_v35  ;;  %v1860_v28 = vmul.f32 %v1858_v40, %v3870_v31  ;;  %v1862_v51 = vmul.f32 %v1858_v40, %v3875_v63  ;;  %v1864_v8 = vmul.f32 %v1858_v40, %v3878_v6 }
 0x30e   : > { %v1866_v41 = vmul.f32 %v1858_v40, %v4398_v24  ;;  %v1836_v34 = vadd.f32 %v1828_v17, %v1804_v26  ;;  %v1838_v5 = vadd.f32 %v1830_v48, %v1806_v15  ;;  %v1840_v47 = vadd.f32 %v1832_v3, %v1808_v52 }
 0x30f   : > { %v1842_v7 = vadd.f32 %v1834_v23, %v1810_v25  ;;  %v1892_v21 = vmul.f32 %v1890_v44, %v4399_v54  ;;  %v1894_v42 = vmul.f32 %v1890_v44, %v4400_v1  ;;  %v1896_v39 = vmul.f32 %v1890_v44, %v4401_v9 }
 0x310   : > { %v1898_v22 = vmul.f32 %v1890_v44, %v4402_v11  ;;  %v1868_v27 = vadd.f32 %v1860_v28, %v1836_v34  ;;  %v1870_v20 = vadd.f32 %v1862_v51, %v1838_v5  ;;  %v1872_v60 = vadd.f32 %v1864_v8, %v1840_v47 }
 0x311   : > { %v1874_v14 = vadd.f32 %v1866_v41, %v1842_v7  ;;  %v1930_v10 = vrot.slane %v1538_v58, %v4393_v2  ;;  %v1954_v36 = vrot.slane %v1538_v58, %v4394_v50  ;;  %v1986_v45 = vrot.slane %v1538_v58, %v4395_v56 }
 0x312   : > { %v2018_v59 = vrot.slane %v1538_v58, %v3744_v16  ;;  %v1900_v49 = vadd.f32 %v1892_v21, %v1868_v27  ;;  %v1902_v12 = vadd.f32 %v1894_v42, %v1870_v20  ;;  %v1904_v33 = vadd.f32 %v1896_v39, %v1872_v60 }
 0x313   : > { %v1906_v4 = vadd.f32 %v1898_v22, %v1874_v14  ;;  %v1932_v2 = vmul.f32 %v1930_v10, %v3838_v62  ;;  %v1934_v50 = vmul.f32 %v1930_v10, %v3841_v61  ;;  %v1936_v56 = vmul.f32 %v1930_v10, %v3844_v57 }
 0x314   : > { %v1938_v16 = vmul.f32 %v1930_v10, %v3847_v55  ;;  %1908 = vst [vmem:[%s4072_s27 + $0x8] sm:$0xff] %v1900_v49  ;;  %1910 = vst [vmem:[%s4072_s27 + $0x18] sm:$0xff] %v1902_v12  ;;  %v1956_v43 = vmul.f32 %v1954_v36, %v3850_v0  ;;  %v1958_v13 = vmul.f32 %v1954_v36, %v3853_v37 }
 0x315   : > { %1912 = vst [vmem:[%s4072_s27 + $0x28] sm:$0xff] %v1904_v33  ;;  %1914 = vst [vmem:[%s4072_s27 + $0x38] sm:$0xff] %v1906_v4  ;;  %v1960_v62 = vmul.f32 %v1954_v36, %v3862_v38  ;;  %v1962_v30 = vmul.f32 %v1954_v36, %v3865_v35  ;;  %v1988_v61 = vmul.f32 %v1986_v45, %v3870_v31 }
 0x316   : > { %v1990_v57 = vmul.f32 %v1986_v45, %v3875_v63  ;;  %v1992_v46 = vmul.f32 %v1986_v45, %v3878_v6  ;;  %v1994_v55 = vmul.f32 %v1986_v45, %v4398_v24 }
 0x317   : > { %2787 = shalt.err (!%p2784_p7)
}
 0x318   : > { %s2788_s8 = scalar_lea.hbm %s4132_s11, 1024  ;;  %s2792_s27 = scalar_lea.hbm %s4403_s13, 2048 }
 0x319   : > { %p2789_p8 = scmp.ne.s32.totalorder %s4132_s11, %s2788_s8  ;;  %p2793_p4 = scmp.lt.s32.totalorder %s4132_s11, %s4403_s13 }
 0x31a   : > { %p2794_p10 = scmp.lt.s32.totalorder %s2792_s27, %s2788_s8 }
 0x31b   : > { %p2790_p0 = pnand %p2789_p8, %p3022_p9 }
 0x31c   : > { %p2795_p13 = por %p2794_p10, %p2793_p4 }
 0x31d   : > { %p2791_p3 = pneg %p2790_p0 }
 0x31f   : > { %p2796_p12 = pnand %p2795_p13, %p2791_p3 }
 0x321   : > { %2799 = shalt.err (!%p2796_p12)
}
 0x322   : > { %2447 = dma.vmem_to_hbm [thread:$0]  (%p3022_p9), %s4134_s28, 1024, %s4132_s11, %s4025_s12, %s2902_s26, %s2902_s26, %s2903_s2   ;;  %v1964_v6 = vadd.f32 %v1956_v43, %v1932_v2  ;;  %v1966_v0 = vadd.f32 %v1958_v13, %v1934_v50  ;;  %v1968_v37 = vadd.f32 %v1960_v62, %v1936_v56  ;;  %v1970_v38 = vadd.f32 %v1962_v30, %v1938_v16 }
 0x323   : > { %v2020_v35 = vmul.f32 %v2018_v59, %v4399_v54  ;;  %v2022_v31 = vmul.f32 %v2018_v59, %v4400_v1  ;;  %v2024_v63 = vmul.f32 %v2018_v59, %v4401_v9  ;;  %v2026_v32 = vmul.f32 %v2018_v59, %v4402_v11  ;;  %s2128_s21 = sshll.u32 %s4098_s24, 4  ;;  %s4404_s11 = sld [smem:[#allocation50_spill]]  ;;  %s4187_s21 = int_to_ptr.vmem [resolvable:$true] %s2128_s21 }
 0x324   : > { %v1996_v18 = vadd.f32 %v1988_v61, %v1964_v6  ;;  %v1998_v53 = vadd.f32 %v1990_v57, %v1966_v0  ;;  %v2000_v19 = vadd.f32 %v1992_v46, %v1968_v37  ;;  %v2002_v29 = vadd.f32 %v1994_v55, %v1970_v38  ;;  %s2059_s30 = scalar_lea.sflag [#allocation13], %s3117_s15  ;;  %s2800_s9 = scalar_lea.vmem %s4187_s21, 1024 }
 0x325   : > { %p2801_p1 = scmp.ne.s32.totalorder %s4187_s21, %s2800_s9  ;;  %s2906_s8 = smov [#allocation12]  }
 0x326   : > { %v2028_v58 = vadd.f32 %v2020_v35, %v1996_v18  ;;  %v2030_v40 = vadd.f32 %v2022_v31, %v1998_v53  ;;  %v2032_v44 = vadd.f32 %v2024_v63, %v2000_v19  ;;  %v2034_v26 = vadd.f32 %v2026_v32, %v2002_v29  ;;  %s2804_s20 = sshll.u32 %s2906_s8, 4  ;;  %s2805_s20 = int_to_ptr.vmem [resolvable:$false] %s2804_s20 }
 0x327   : > { %p2802_p2 = pnand %p2801_p1, %p3022_p9  ;;  %p2807_p6 = scmp.lt.s32.totalorder %s4187_s21, %s2805_s20 }
 0x328   : > { %2036 = vst [vmem:[%s4098_s24 + $0x8] sm:$0xff] %v2028_v58  ;;  %2038 = vst [vmem:[%s4098_s24 + $0x18] sm:$0xff] %v2030_v40 }
 0x329   : > { %s4185_s23 = scalar_lea.hbm %s4404_s11, %s3911_s16  ;;  %2040 = vst [vmem:[%s4098_s24 + $0x28] sm:$0xff] %v2032_v44  ;;  %2042 = vst [vmem:[%s4098_s24 + $0x38] sm:$0xff] %v2034_v26  ;;  %p2803_p5 = pneg %p2802_p2 }
 0x32a   : > { %s2806_s16 = scalar_lea.vmem %s2805_s20, 2048 }
 0x32b   : > { %p2808_p7 = scmp.lt.s32.totalorder %s2806_s16, %s2800_s9 }
 0x32d   : > { %p2809_p8 = por %p2808_p7, %p2807_p6 }
 0x32f   : > { %p2810_p0 = pnand %p2809_p8, %p2803_p5 }
 0x331   : > { %2813 = shalt.err (!%p2810_p0)
}
 0x332   : > { %s2814_s24 = scalar_lea.hbm %s4185_s23, 1024  ;;  %s2818_s27 = scalar_lea.hbm %s4404_s11, 2048 }
 0x333   : > { %p2815_p3 = scmp.ne.s32.totalorder %s4185_s23, %s2814_s24  ;;  %p2819_p13 = scmp.lt.s32.totalorder %s4185_s23, %s4404_s11 }
 0x334   : > { %p2820_p12 = scmp.lt.s32.totalorder %s2818_s27, %s2814_s24 }
 0x335   : > { %p2816_p4 = pnand %p2815_p3, %p3022_p9 }
 0x336   : > { %p2821_p1 = por %p2820_p12, %p2819_p13 }
 0x337   : > { %p2817_p10 = pneg %p2816_p4 }
 0x339   : > { %p2822_p2 = pnand %p2821_p1, %p2817_p10 }
 0x33b   : > { %2825 = shalt.err (!%p2822_p2)
}
 0x33c   : > { %2448 = dma.vmem_to_hbm [thread:$0]  (%p3022_p9), %s4187_s21, 1024, %s4185_s23, %s2059_s30, %s2902_s26, %s2902_s26, %s2903_s2  }
 0x33d PF: > { %s4405_s12 = sld [smem:[#allocation19_spill]]  ;;  %p4407_p5 = scmp.ge.s32.totalorder %s2892_s22, 2 }
 0x33f   : > { %p2464_p6 = pnand %p4407_p5, %p3031_p11 }
 0x341   : > { %p2465_p7 = pneg %p2464_p6 }
 0x343   : > { %s2143_s9 = sand.u32 1, %s4405_s12  }
 0x344   : > { %s2144_s8 = scalar_lea.sflag [#allocation4], %s2143_s9 }
 0x345   : > { %2859 = dma.done.wait (%p2465_p7), %s2144_s8, 1024  }
 0x346   : > { %2861 = vsyncadd (%p2465_p7), %s2144_s8, 4294966272  ;;  %s4408_s17 = sadd.s32 4294967294, %s2892_s22  }
 0x347   : > { %s2152_s20 = sand.u32 1, %s4408_s17  }
 0x348   : > { %s2153_s16 = scalar_lea.sflag [#allocation10], %s2152_s20 }
 0x349   : > { %2863 = dma.done.wait (%p2465_p7), %s2153_s16, 2048  }
 0x34a   : > { %2865 = vsyncadd (%p2465_p7), %s2153_s16, 4294965248  ;;  %s2171_s24 = scalar_lea.sflag [#allocation13], %s2143_s9 }
 0x34b   : > { %2867 = dma.done.wait (%p2465_p7), %s2171_s24, 1024  }
 0x34c   : > { %2869 = vsyncadd (%p2465_p7), %s2171_s24, 4294966272  ;;  %s37_s22 = sadd.s32 1, %s2892_s22   ;;  %s4409_s26 = sld [smem:[#allocation23_spill]] }
 0x34d   : > { %p34_p9 = scmp.ge.s32.totalorder %s37_s22, 4   ;;  %s4410_s20 = sld [smem:[#allocation20_spill]] }
 0x34e   : > { %s4411_s21 = sld [smem:[#allocation21_spill]]  ;;  %s4412_s17 = smov %s2876_s18 }
 0x34f   : > { %s4413_s18 = smov %s2880_s19  ;;  %36 = sbr.rel (!%p34_p9) target bundleno = 19 (0x13), region = 173 }
 0x352   : > { %s4414_s19 = smov %s4409_s26 }
 0x354   :  { %2176 = vsyncpa [#allocation3], 1 }
 0x355   :  { %2178 = vsyncpa [#allocation3 + $0x1], 1 }
 0x356   :  { %2179 = vsyncpa [#allocation6], 1 }
 0x357   :  { %2181 = vsyncpa [#allocation6 + $0x1], 1 }
 0x358   :  { %2182 = vsyncpa [#allocation4], 1 }
 0x359   :  { %2184 = vsyncpa [#allocation4 + $0x1], 1 }
 0x35a   :  { %2185 = vsyncpa [#allocation10], 1 }
 0x35b   :  { %2187 = vsyncpa [#allocation10 + $0x1], 1 }
 0x35c   :  { %2188 = vsyncpa [#allocation13], 1 }
 0x35d   :  { %2190 = vsyncpa [#allocation13 + $0x1], 1 }

</bundles_post_ra>
